<compile_context>
chip_gen: v7x
topology: tpu7x:2x2x1
jax: 0.10.0
libtpu: 0.0.40
codegen_flags: <defaults>
</compile_context>

<pallas_src>
import functools

import jax
import jax.numpy as jnp
from jax.experimental import pallas as pl
from jax.experimental.pallas import tpu as pltpu


def _ecre_kernel(x_ref, w_ref, b_ref, sel_ref, edge_ref, o_ref, x9_ref, *, w_img):
    """One (batch, row-tile) step: 3x3 conv + folded BN, stored pixel-shuffled.

    x_ref:    (1, 1, C_in, Lblk)  bf16  2x2-duplicated, row-padded flat halo tile
    w_ref:    (4, C_in, 9*C_in)   bf16  BN-scale-folded weights, ij = 2*i + j
    b_ref:    (4, C_in, 1)        f32   BN-folded bias per (ij, c)
    sel_ref:  (1, Td)             i32   2*(out-row parity) + (out-col parity)
    edge_ref: (2, Td)             bf16  column masks for kw=0 / kw=2 taps
    o_ref:    (1, C_in, Td)       f32   pixel-shuffled output block (lane-dense)
    x9_ref:   (9*C_in, Td)        bf16  scratch: stacked 9-tap operand
    """
    c_in = x_ref.shape[2]
    td = o_ref.shape[2]

    # Assemble the nine 3x3 taps once into a single (9*C_in, Td) MXU operand.
    # kw-edge taps are masked where the flat layout would wrap across rows
    # (this reproduces the conv's zero column padding).
    for kh in range(3):
        for kw in range(3):
            k = kh * 3 + kw
            s = kh * 4 * w_img + 2 * kw           # fixed flat tap offset
            xk = x_ref[0, 0, :, s:s + td]         # (C_in, Td) bf16
            if kw == 0:
                xk = xk * edge_ref[0:1, :]
            elif kw == 2:
                xk = xk * edge_ref[1:2, :]
            x9_ref[k * c_in:(k + 1) * c_in, :] = xk

    x9 = x9_ref[...]                              # (9*C_in, Td) bf16

    # Four (i, j) weight variants over the shared tap slab: single K=9*C_in dot
    # each, f32 accumulation, folded bias added directly (no zero-init chain).
    y00 = jnp.dot(w_ref[0], x9, preferred_element_type=jnp.float32) + b_ref[0]
    y01 = jnp.dot(w_ref[1], x9, preferred_element_type=jnp.float32) + b_ref[1]
    y10 = jnp.dot(w_ref[2], x9, preferred_element_type=jnp.float32) + b_ref[2]
    y11 = jnp.dot(w_ref[3], x9, preferred_element_type=jnp.float32) + b_ref[3]

    # Per-lane parity select = the PixelShuffle interleave (VPU, mask precomputed
    # on the host so no integer div/mod is needed in-kernel).
    sel = sel_ref[...]                            # (1, Td) int32, broadcasts
    y_i0 = jnp.where(sel == 0, y00, y01)          # row parity 0: pick j
    y_i1 = jnp.where(sel == 2, y10, y11)          # row parity 1: pick j
    out = jnp.where(sel < 2, y_i0, y_i1)
    o_ref[0] = out.astype(o_ref.dtype)


def _vmem_limit_bytes():
    """Generation-aware VMEM limit: ~48 MiB on v7x (64 MiB part), ~96 MiB on
    v5e/v6e (128 MiB parts); safe fallback if the query is unavailable."""
    try:
        cap = int(pltpu.get_tpu_info().vmem_capacity_bytes)
    except Exception:
        cap = 64 * 1024 * 1024
    return min(cap * 3 // 4, 96 * 1024 * 1024)


def _pick_tile_h(H, W, c_in, budget_bytes):
    """Largest row-tile TH (divisor of H) whose per-step VMEM footprint
    (double-buffered I/O blocks + tap scratch + f32 temporaries) fits."""

    def step_bytes(th):
        td = 4 * th * W
        lblk = (th + 2) * 4 * W + 4
        in_blk = c_in * lblk * 2              # bf16 input block
        out_blk = c_in * td * 4               # f32 output block
        x9 = 9 * c_in * td * 2                # bf16 tap scratch
        temps = 5 * c_in * td * 4             # y00..y11 + select temporaries
        return 2 * in_blk + 2 * out_blk + x9 + temps

    def lane_ok(th):
        # Output block lane length must be a multiple of 128 unless it spans
        # the whole (flattened) output axis, i.e. unless th == H.
        return th == H or (4 * th * W) % 128 == 0

    cands = [d for d in range(H, 0, -1)
             if H % d == 0 and lane_ok(d) and step_bytes(d) <= budget_bytes]
    if cands:
        return cands[0]
    small = [d for d in range(1, H + 1) if H % d == 0 and lane_ok(d)]
    return small[0] if small else H


def ecre_forward(x_nchw, w, b_conv, gamma, beta, running_mean, running_var,
                 eps=1e-5, up_scale=2, tile_h=None):
    """Forward pass of ECRE. x_nchw: (B, C_in, H, W) -> (B, C_in, 2H, 2W)."""
    assert up_scale == 2, "kernel is specialized for PixelShuffle(2)"
    B, C_in, H, W = x_nchw.shape
    C_out = C_in * 4

    vmem_limit = _vmem_limit_bytes()
    TH = tile_h if tile_h is not None else _pick_tile_h(H, W, C_in,
                                                        int(vmem_limit * 0.7))
    assert H % TH == 0 and (TH == H or (4 * TH * W) % 128 == 0), (H, W, TH)
    nT = H // TH
    Td = 4 * TH * W                       # pixel-shuffled lanes per tile
    Lblk = (TH + 2) * 4 * W + 4           # flat halo tile length (incl. pads)
    Ltot = (H + 2) * 4 * W + 4

    # ---- input staging: bf16, zero ROW padding, 2x2 pixel duplication, flat ----
    # (one fused XLA pass; the duplication is what lets every pixel-shuffled
    #  output lane use fixed tap offsets so the kernel can store the final
    #  layout directly and the tail pass disappears)
    xb = x_nchw.astype(jnp.bfloat16)
    xp = jnp.pad(xb, ((0, 0), (0, 0), (1, 1), (0, 0)))            # rows only
    xd = jnp.repeat(jnp.repeat(xp, 2, axis=2), 2, axis=3)         # (B,C,2H+4,2W)
    S = xd.reshape(B, C_in, (2 * H + 4) * 2 * W)
    S = jnp.pad(S, ((0, 0), (0, 0), (2, 2)))                      # (B,C,Ltot)
    if nT == 1:
        x_tiles = S[:, None]                                      # (B,1,C,Ltot)
    else:
        x_tiles = jnp.stack(
            [S[:, :, t * TH * 4 * W: t * TH * 4 * W + Lblk] for t in range(nT)],
            axis=1)                                               # (B,nT,C,Lblk)

    # ---- fold BatchNorm (eval) into the conv: scale -> weights (f32 then bf16),
    #      bias -> per-(i,j,c) f32 bias ----
    scale = (gamma / jnp.sqrt(running_var + eps)).astype(jnp.float32)
    bias_eff = (scale * (b_conv - running_mean) + beta).astype(jnp.float32)
    w_s = w.astype(jnp.float32) * scale[:, None, None, None]
    w4 = jnp.transpose(w_s.reshape(C_in, 4, C_in, 3, 3),
                       (1, 0, 3, 4, 2)).reshape(4, C_in, 9 * C_in)
    w4 = w4.astype(jnp.bfloat16)                                  # (4, C_in, 9*C_in)
    b4 = jnp.transpose(bias_eff.reshape(C_in, 4), (1, 0)).reshape(4, C_in, 1)

    # ---- tiny per-lane parity / edge-mask tables (same block every step) ----
    p = jnp.arange(Td, dtype=jnp.int32)
    co = p % (2 * W)                              # output column within a row
    ro = p // (2 * W)                             # output row within the tile
    sel = ((ro % 2) * 2 + (co % 2)).astype(jnp.int32).reshape(1, Td)
    edge = jnp.stack([(co >= 2).astype(jnp.bfloat16),
                      (co < 2 * W - 2).astype(jnp.bfloat16)])     # (2, Td)

    out_flat = pl.pallas_call(
        functools.partial(_ecre_kernel, w_img=W),
        out_shape=jax.ShapeDtypeStruct((B, C_in, nT * Td), x_nchw.dtype),
        grid=(B, nT),
        in_specs=[
            pl.BlockSpec((1, 1, C_in, Lblk), lambda bi, ti: (bi, ti, 0, 0)),
            pl.BlockSpec((4, C_in, 9 * C_in), lambda bi, ti: (0, 0, 0)),
            pl.BlockSpec((4, C_in, 1), lambda bi, ti: (0, 0, 0)),
            pl.BlockSpec((1, Td), lambda bi, ti: (0, 0)),
            pl.BlockSpec((2, Td), lambda bi, ti: (0, 0)),
        ],
        out_specs=pl.BlockSpec((1, C_in, Td), lambda bi, ti: (bi, 0, ti)),
        scratch_shapes=[pltpu.VMEM((9 * C_in, Td), jnp.bfloat16)],
        compiler_params=pltpu.CompilerParams(
            dimension_semantics=("parallel", "parallel"),
            vmem_limit_bytes=vmem_limit),
    )(x_tiles, w4, b4, sel, edge)

    # PixelShuffle(2) is now a pure (free) reshape of the kernel's output layout.
    return out_flat.reshape(B, C_in, 2 * H, 2 * W)


def ecre_reference(x, w, b, gamma, beta, mean, var, eps=1e-5, r=2):
    """Plain-JAX reference matching the PyTorch module in eval mode."""
    y = jax.lax.conv_general_dilated(
        x, w, window_strides=(1, 1), padding=((1, 1), (1, 1)),
        dimension_numbers=("NCHW", "OIHW", "NCHW"))
    y = y + b.reshape(1, -1, 1, 1)
    scale = gamma / jnp.sqrt(var + eps)
    y = scale.reshape(1, -1, 1, 1) * (y - mean.reshape(1, -1, 1, 1)) \
        + beta.reshape(1, -1, 1, 1)
    B, Co, H, W = y.shape
    C = Co // (r * r)
    y = y.reshape(B, C, r, r, H, W).transpose(0, 1, 4, 2, 5, 3)
    return y.reshape(B, C, r * H, r * W)


if __name__ == "__main__":
    key = jax.random.PRNGKey(0)
    k_x, k_w, k_b, k_g, k_be, k_m, k_v = jax.random.split(key, 7)

    B, C_in, H, W = 2, 4, 16, 16
    up_scale = 2
    C_out = C_in * up_scale ** 2

    x = jax.random.normal(k_x, (B, C_in, H, W), dtype=jnp.float32)

    fan_in = C_in * 3 * 3
    bound = 1.0 / (fan_in ** 0.5)
    w = jax.random.uniform(k_w, (C_out, C_in, 3, 3), jnp.float32, -bound, bound)
    b = jax.random.uniform(k_b, (C_out,), jnp.float32, -bound, bound)
    gamma = jax.random.uniform(k_g, (C_out,), jnp.float32, 0.5, 1.5)
    beta = 0.1 * jax.random.normal(k_be, (C_out,), jnp.float32)
    running_mean = 0.1 * jax.random.normal(k_m, (C_out,), jnp.float32)
    running_var = jax.random.uniform(k_v, (C_out,), jnp.float32, 0.5, 1.5)
    # TODO(synk): training-mode BatchNorm (batch statistics) not modeled;
    # eval-mode running-stats form is used, matching module.eval() semantics.

    fwd = jax.jit(functools.partial(ecre_forward, up_scale=up_scale))
    out = jax.block_until_ready(fwd(x, w, b, gamma, beta, running_mean,
                                    running_var))

    # Reference on bf16-rounded x and on weights that mirror the kernel's
    # fold-in-f32-then-round-to-bf16 quantization (folded weights are divided
    # back by the BN scale so ecre_reference can stay faithful to the module).
    eps = 1e-5
    scale = gamma / jnp.sqrt(running_var + eps)
    w_fold_q = (w * scale[:, None, None, None]).astype(jnp.bfloat16)
    w_ref_q = w_fold_q.astype(jnp.float32) / scale[:, None, None, None]
    xr = x.astype(jnp.bfloat16).astype(jnp.float32)
    ref = ecre_reference(xr, w_ref_q, b, gamma, beta, running_mean, running_var,
                         eps=eps, r=up_scale)

    assert out.shape == (B, C_in, up_scale * H, up_scale * W), out.shape
    max_err = float(jnp.max(jnp.abs(out - ref)))
    assert jnp.allclose(out, ref, rtol=2e-2, atol=2e-2), max_err

    print("KERNEL_OK")
</pallas_src>

<mosaic_0001>
module attributes {stable_mosaic.version = 11 : i64} {
  func.func @_ecre_kernel(%arg0: i32, %arg1: i32, %arg2: memref<1x1x4x1156xbf16, #tpu.memory_space<vmem>>, %arg3: memref<4x4x36xbf16, #tpu.memory_space<vmem>>, %arg4: memref<4x4x1xf32, #tpu.memory_space<vmem>>, %arg5: memref<1x1024xi32, #tpu.memory_space<vmem>>, %arg6: memref<2x1024xbf16, #tpu.memory_space<vmem>>, %arg7: memref<1x4x1024xf32, #tpu.memory_space<vmem>>, %arg8: memref<36x1024xbf16, #tpu.memory_space<vmem>>) attributes {dimension_semantics = [#tpu.dimension_semantics<parallel>, #tpu.dimension_semantics<parallel>], iteration_bounds = array<i64: 2, 1>, scalar_prefetch = 0 : i64, scratch_operands = 1 : i64, tpu.core_type = #tpu.core_type<tc>, window_params = [{transform_indices = @transform_0, window_bounds = array<i64: 1, 1, 4, 1156>}, {pipeline_mode = #tpu.pipeline_mode<synchronous>, transform_indices = @transform_1, window_bounds = array<i64: 4, 4, 36>}, {pipeline_mode = #tpu.pipeline_mode<synchronous>, transform_indices = @transform_2, window_bounds = array<i64: 4, 4, 1>}, {pipeline_mode = #tpu.pipeline_mode<synchronous>, transform_indices = @transform_3, window_bounds = array<i64: 1, 1024>}, {pipeline_mode = #tpu.pipeline_mode<synchronous>, transform_indices = @transform_4, window_bounds = array<i64: 2, 1024>}, {transform_indices = @transform_5, window_bounds = array<i64: 1, 4, 1024>}]} {
    %c0 = arith.constant 0 : index
    %c0_0 = arith.constant 0 : index
    %c0_1 = arith.constant 0 : index
    %c0_2 = arith.constant 0 : index
    %0 = vector.load %arg2[%c0, %c0_0, %c0_1, %c0_2] : memref<1x1x4x1156xbf16, #tpu.memory_space<vmem>>, vector<1x1x4x1024xbf16>
    %1 = vector.shape_cast %0 : vector<1x1x4x1024xbf16> to vector<4x1024xbf16>
    %c0_3 = arith.constant 0 : index
    %c0_4 = arith.constant 0 : index
    %2 = vector.load %arg6[%c0_3, %c0_4] : memref<2x1024xbf16, #tpu.memory_space<vmem>>, vector<1x1024xbf16>
    %3 = vector.broadcast %2 : vector<1x1024xbf16> to vector<4x1024xbf16>
    %4 = arith.mulf %1, %3 : vector<4x1024xbf16>
    %c0_5 = arith.constant 0 : index
    %c0_6 = arith.constant 0 : index
    %5 = vector.load %arg8[%c0_5, %c0_6] : memref<36x1024xbf16, #tpu.memory_space<vmem>>, vector<4x1024xbf16>
    tpu.vector_store %arg8[%c0_5, %c0_6], %4 {strides = array<i32>} : memref<36x1024xbf16, #tpu.memory_space<vmem>>, vector<4x1024xbf16>,
    %c0_7 = arith.constant 0 : index
    %c0_8 = arith.constant 0 : index
    %c0_9 = arith.constant 0 : index
    %c2 = arith.constant 2 : index
    %6 = vector.load %arg2[%c0_7, %c0_8, %c0_9, %c2] : memref<1x1x4x1156xbf16, #tpu.memory_space<vmem>>, vector<1x1x4x1024xbf16>
    %7 = vector.shape_cast %6 : vector<1x1x4x1024xbf16> to vector<4x1024xbf16>
    %c4 = arith.constant 4 : index
    %c0_10 = arith.constant 0 : index
    %8 = vector.load %arg8[%c4, %c0_10] : memref<36x1024xbf16, #tpu.memory_space<vmem>>, vector<4x1024xbf16>
    tpu.vector_store %arg8[%c4, %c0_10], %7 {strides = array<i32>} : memref<36x1024xbf16, #tpu.memory_space<vmem>>, vector<4x1024xbf16>,
    %c0_11 = arith.constant 0 : index
    %c0_12 = arith.constant 0 : index
    %c0_13 = arith.constant 0 : index
    %c4_14 = arith.constant 4 : index
    %9 = vector.load %arg2[%c0_11, %c0_12, %c0_13, %c4_14] : memref<1x1x4x1156xbf16, #tpu.memory_space<vmem>>, vector<1x1x4x1024xbf16>
    %10 = vector.shape_cast %9 : vector<1x1x4x1024xbf16> to vector<4x1024xbf16>
    %c1 = arith.constant 1 : index
    %c0_15 = arith.constant 0 : index
    %11 = vector.load %arg6[%c1, %c0_15] : memref<2x1024xbf16, #tpu.memory_space<vmem>>, vector<1x1024xbf16>
    %12 = vector.broadcast %11 : vector<1x1024xbf16> to vector<4x1024xbf16>
    %13 = arith.mulf %10, %12 : vector<4x1024xbf16>
    %c8 = arith.constant 8 : index
    %c0_16 = arith.constant 0 : index
    %14 = vector.load %arg8[%c8, %c0_16] : memref<36x1024xbf16, #tpu.memory_space<vmem>>, vector<4x1024xbf16>
    tpu.vector_store %arg8[%c8, %c0_16], %13 {strides = array<i32>} : memref<36x1024xbf16, #tpu.memory_space<vmem>>, vector<4x1024xbf16>,
    %c0_17 = arith.constant 0 : index
    %c0_18 = arith.constant 0 : index
    %c0_19 = arith.constant 0 : index
    %c64 = arith.constant 64 : index
    %15 = vector.load %arg2[%c0_17, %c0_18, %c0_19, %c64] : memref<1x1x4x1156xbf16, #tpu.memory_space<vmem>>, vector<1x1x4x1024xbf16>
    %16 = vector.shape_cast %15 : vector<1x1x4x1024xbf16> to vector<4x1024xbf16>
    %c0_20 = arith.constant 0 : index
    %c0_21 = arith.constant 0 : index
    %17 = vector.load %arg6[%c0_20, %c0_21] : memref<2x1024xbf16, #tpu.memory_space<vmem>>, vector<1x1024xbf16>
    %18 = vector.broadcast %17 : vector<1x1024xbf16> to vector<4x1024xbf16>
    %19 = arith.mulf %16, %18 : vector<4x1024xbf16>
    %c12 = arith.constant 12 : index
    %c0_22 = arith.constant 0 : index
    %20 = vector.load %arg8[%c12, %c0_22] : memref<36x1024xbf16, #tpu.memory_space<vmem>>, vector<4x1024xbf16>
    tpu.vector_store %arg8[%c12, %c0_22], %19 {strides = array<i32>} : memref<36x1024xbf16, #tpu.memory_space<vmem>>, vector<4x1024xbf16>,
    %c0_23 = arith.constant 0 : index
    %c0_24 = arith.constant 0 : index
    %c0_25 = arith.constant 0 : index
    %c66 = arith.constant 66 : index
    %21 = vector.load %arg2[%c0_23, %c0_24, %c0_25, %c66] : memref<1x1x4x1156xbf16, #tpu.memory_space<vmem>>, vector<1x1x4x1024xbf16>
    %22 = vector.shape_cast %21 : vector<1x1x4x1024xbf16> to vector<4x1024xbf16>
    %c16 = arith.constant 16 : index
    %c0_26 = arith.constant 0 : index
    %23 = vector.load %arg8[%c16, %c0_26] : memref<36x1024xbf16, #tpu.memory_space<vmem>>, vector<4x1024xbf16>
    tpu.vector_store %arg8[%c16, %c0_26], %22 {strides = array<i32>} : memref<36x1024xbf16, #tpu.memory_space<vmem>>, vector<4x1024xbf16>,
    %c0_27 = arith.constant 0 : index
    %c0_28 = arith.constant 0 : index
    %c0_29 = arith.constant 0 : index
    %c68 = arith.constant 68 : index
    %24 = vector.load %arg2[%c0_27, %c0_28, %c0_29, %c68] : memref<1x1x4x1156xbf16, #tpu.memory_space<vmem>>, vector<1x1x4x1024xbf16>
    %25 = vector.shape_cast %24 : vector<1x1x4x1024xbf16> to vector<4x1024xbf16>
    %c1_30 = arith.constant 1 : index
    %c0_31 = arith.constant 0 : index
    %26 = vector.load %arg6[%c1_30, %c0_31] : memref<2x1024xbf16, #tpu.memory_space<vmem>>, vector<1x1024xbf16>
    %27 = vector.broadcast %26 : vector<1x1024xbf16> to vector<4x1024xbf16>
    %28 = arith.mulf %25, %27 : vector<4x1024xbf16>
    %c20 = arith.constant 20 : index
    %c0_32 = arith.constant 0 : index
    %29 = vector.load %arg8[%c20, %c0_32] : memref<36x1024xbf16, #tpu.memory_space<vmem>>, vector<4x1024xbf16>
    tpu.vector_store %arg8[%c20, %c0_32], %28 {strides = array<i32>} : memref<36x1024xbf16, #tpu.memory_space<vmem>>, vector<4x1024xbf16>,
    %c0_33 = arith.constant 0 : index
    %c0_34 = arith.constant 0 : index
    %c0_35 = arith.constant 0 : index
    %c128 = arith.constant 128 : index
    %30 = vector.load %arg2[%c0_33, %c0_34, %c0_35, %c128] : memref<1x1x4x1156xbf16, #tpu.memory_space<vmem>>, vector<1x1x4x1024xbf16>
    %31 = vector.shape_cast %30 : vector<1x1x4x1024xbf16> to vector<4x1024xbf16>
    %c0_36 = arith.constant 0 : index
    %c0_37 = arith.constant 0 : index
    %32 = vector.load %arg6[%c0_36, %c0_37] : memref<2x1024xbf16, #tpu.memory_space<vmem>>, vector<1x1024xbf16>
    %33 = vector.broadcast %32 : vector<1x1024xbf16> to vector<4x1024xbf16>
    %34 = arith.mulf %31, %33 : vector<4x1024xbf16>
    %c24 = arith.constant 24 : index
    %c0_38 = arith.constant 0 : index
    %35 = vector.load %arg8[%c24, %c0_38] : memref<36x1024xbf16, #tpu.memory_space<vmem>>, vector<4x1024xbf16>
    tpu.vector_store %arg8[%c24, %c0_38], %34 {strides = array<i32>} : memref<36x1024xbf16, #tpu.memory_space<vmem>>, vector<4x1024xbf16>,
    %c0_39 = arith.constant 0 : index
    %c0_40 = arith.constant 0 : index
    %c0_41 = arith.constant 0 : index
    %c130 = arith.constant 130 : index
    %36 = vector.load %arg2[%c0_39, %c0_40, %c0_41, %c130] : memref<1x1x4x1156xbf16, #tpu.memory_space<vmem>>, vector<1x1x4x1024xbf16>
    %37 = vector.shape_cast %36 : vector<1x1x4x1024xbf16> to vector<4x1024xbf16>
    %c28 = arith.constant 28 : index
    %c0_42 = arith.constant 0 : index
    %38 = vector.load %arg8[%c28, %c0_42] : memref<36x1024xbf16, #tpu.memory_space<vmem>>, vector<4x1024xbf16>
    tpu.vector_store %arg8[%c28, %c0_42], %37 {strides = array<i32>} : memref<36x1024xbf16, #tpu.memory_space<vmem>>, vector<4x1024xbf16>,
    %c0_43 = arith.constant 0 : index
    %c0_44 = arith.constant 0 : index
    %c0_45 = arith.constant 0 : index
    %c132 = arith.constant 132 : index
    %39 = vector.load %arg2[%c0_43, %c0_44, %c0_45, %c132] : memref<1x1x4x1156xbf16, #tpu.memory_space<vmem>>, vector<1x1x4x1024xbf16>
    %40 = vector.shape_cast %39 : vector<1x1x4x1024xbf16> to vector<4x1024xbf16>
    %c1_46 = arith.constant 1 : index
    %c0_47 = arith.constant 0 : index
    %41 = vector.load %arg6[%c1_46, %c0_47] : memref<2x1024xbf16, #tpu.memory_space<vmem>>, vector<1x1024xbf16>
    %42 = vector.broadcast %41 : vector<1x1024xbf16> to vector<4x1024xbf16>
    %43 = arith.mulf %40, %42 : vector<4x1024xbf16>
    %c32 = arith.constant 32 : index
    %c0_48 = arith.constant 0 : index
    %44 = vector.load %arg8[%c32, %c0_48] : memref<36x1024xbf16, #tpu.memory_space<vmem>>, vector<4x1024xbf16>
    tpu.vector_store %arg8[%c32, %c0_48], %43 {strides = array<i32>} : memref<36x1024xbf16, #tpu.memory_space<vmem>>, vector<4x1024xbf16>,
    %c0_49 = arith.constant 0 : index
    %c0_50 = arith.constant 0 : index
    %45 = vector.load %arg8[%c0_49, %c0_50] : memref<36x1024xbf16, #tpu.memory_space<vmem>>, vector<36x1024xbf16>
    %c0_51 = arith.constant 0 : index
    %c0_52 = arith.constant 0 : index
    %c0_53 = arith.constant 0 : index
    %46 = vector.load %arg3[%c0_51, %c0_52, %c0_53] : memref<4x4x36xbf16, #tpu.memory_space<vmem>>, vector<1x4x36xbf16>
    %47 = vector.shape_cast %46 : vector<1x4x36xbf16> to vector<4x36xbf16>
    %cst = arith.constant dense<0.000000e+00> : vector<4x1024xf32>
    %48 = tpu.matmul %47, %45, %cst {dimension_numbers = #tpu.dot_dimension_numbers<[1], [0], [0], [1], [0, 0, 1, 1], [], []>} : vector<4x36xbf16>, vector<36x1024xbf16>, vector<4x1024xf32> -> vector<4x1024xf32>
    %c0_54 = arith.constant 0 : index
    %c0_55 = arith.constant 0 : index
    %c0_56 = arith.constant 0 : index
    %49 = vector.load %arg4[%c0_54, %c0_55, %c0_56] : memref<4x4x1xf32, #tpu.memory_space<vmem>>, vector<1x4x1xf32>
    %50 = vector.shape_cast %49 : vector<1x4x1xf32> to vector<4x1xf32>
    %51 = vector.broadcast %50 : vector<4x1xf32> to vector<4x1024xf32>
    %52 = arith.addf %48, %51 : vector<4x1024xf32>
    %c1_57 = arith.constant 1 : index
    %c0_58 = arith.constant 0 : index
    %c0_59 = arith.constant 0 : index
    %53 = vector.load %arg3[%c1_57, %c0_58, %c0_59] : memref<4x4x36xbf16, #tpu.memory_space<vmem>>, vector<1x4x36xbf16>
    %54 = vector.shape_cast %53 : vector<1x4x36xbf16> to vector<4x36xbf16>
    %cst_60 = arith.constant dense<0.000000e+00> : vector<4x1024xf32>
    %55 = tpu.matmul %54, %45, %cst_60 {dimension_numbers = #tpu.dot_dimension_numbers<[1], [0], [0], [1], [0, 0, 1, 1], [], []>} : vector<4x36xbf16>, vector<36x1024xbf16>, vector<4x1024xf32> -> vector<4x1024xf32>
    %c1_61 = arith.constant 1 : index
    %c0_62 = arith.constant 0 : index
    %c0_63 = arith.constant 0 : index
    %56 = vector.load %arg4[%c1_61, %c0_62, %c0_63] : memref<4x4x1xf32, #tpu.memory_space<vmem>>, vector<1x4x1xf32>
    %57 = vector.shape_cast %56 : vector<1x4x1xf32> to vector<4x1xf32>
    %58 = vector.broadcast %57 : vector<4x1xf32> to vector<4x1024xf32>
    %59 = arith.addf %55, %58 : vector<4x1024xf32>
    %c2_64 = arith.constant 2 : index
    %c0_65 = arith.constant 0 : index
    %c0_66 = arith.constant 0 : index
    %60 = vector.load %arg3[%c2_64, %c0_65, %c0_66] : memref<4x4x36xbf16, #tpu.memory_space<vmem>>, vector<1x4x36xbf16>
    %61 = vector.shape_cast %60 : vector<1x4x36xbf16> to vector<4x36xbf16>
    %cst_67 = arith.constant dense<0.000000e+00> : vector<4x1024xf32>
    %62 = tpu.matmul %61, %45, %cst_67 {dimension_numbers = #tpu.dot_dimension_numbers<[1], [0], [0], [1], [0, 0, 1, 1], [], []>} : vector<4x36xbf16>, vector<36x1024xbf16>, vector<4x1024xf32> -> vector<4x1024xf32>
    %c2_68 = arith.constant 2 : index
    %c0_69 = arith.constant 0 : index
    %c0_70 = arith.constant 0 : index
    %63 = vector.load %arg4[%c2_68, %c0_69, %c0_70] : memref<4x4x1xf32, #tpu.memory_space<vmem>>, vector<1x4x1xf32>
    %64 = vector.shape_cast %63 : vector<1x4x1xf32> to vector<4x1xf32>
    %65 = vector.broadcast %64 : vector<4x1xf32> to vector<4x1024xf32>
    %66 = arith.addf %62, %65 : vector<4x1024xf32>
    %c3 = arith.constant 3 : index
    %c0_71 = arith.constant 0 : index
    %c0_72 = arith.constant 0 : index
    %67 = vector.load %arg3[%c3, %c0_71, %c0_72] : memref<4x4x36xbf16, #tpu.memory_space<vmem>>, vector<1x4x36xbf16>
    %68 = vector.shape_cast %67 : vector<1x4x36xbf16> to vector<4x36xbf16>
    %cst_73 = arith.constant dense<0.000000e+00> : vector<4x1024xf32>
    %69 = tpu.matmul %68, %45, %cst_73 {dimension_numbers = #tpu.dot_dimension_numbers<[1], [0], [0], [1], [0, 0, 1, 1], [], []>} : vector<4x36xbf16>, vector<36x1024xbf16>, vector<4x1024xf32> -> vector<4x1024xf32>
    %c3_74 = arith.constant 3 : index
    %c0_75 = arith.constant 0 : index
    %c0_76 = arith.constant 0 : index
    %70 = vector.load %arg4[%c3_74, %c0_75, %c0_76] : memref<4x4x1xf32, #tpu.memory_space<vmem>>, vector<1x4x1xf32>
    %71 = vector.shape_cast %70 : vector<1x4x1xf32> to vector<4x1xf32>
    %72 = vector.broadcast %71 : vector<4x1xf32> to vector<4x1024xf32>
    %73 = arith.addf %69, %72 : vector<4x1024xf32>
    %c0_77 = arith.constant 0 : index
    %c0_78 = arith.constant 0 : index
    %74 = vector.load %arg5[%c0_77, %c0_78] : memref<1x1024xi32, #tpu.memory_space<vmem>>, vector<1x1024xi32>
    %c0_i32 = arith.constant 0 : i32
    %75 = vector.broadcast %c0_i32 : i32 to vector<1x1024xi32>
    %76 = arith.cmpi eq, %74, %75 : vector<1x1024xi32>
    %77 = vector.shape_cast %76 : vector<1x1024xi1> to vector<1x1024xi1>
    %78 = vector.broadcast %77 : vector<1x1024xi1> to vector<4x1024xi1>
    %79 = arith.select %78, %52, %59 : vector<4x1024xi1>, vector<4x1024xf32>
    %c2_i32 = arith.constant 2 : i32
    %80 = vector.broadcast %c2_i32 : i32 to vector<1x1024xi32>
    %81 = arith.cmpi eq, %74, %80 : vector<1x1024xi32>
    %82 = vector.shape_cast %81 : vector<1x1024xi1> to vector<1x1024xi1>
    %83 = vector.broadcast %82 : vector<1x1024xi1> to vector<4x1024xi1>
    %84 = arith.select %83, %66, %73 : vector<4x1024xi1>, vector<4x1024xf32>
    %c2_i32_79 = arith.constant 2 : i32
    %85 = vector.broadcast %c2_i32_79 : i32 to vector<1x1024xi32>
    %86 = arith.cmpi slt, %74, %85 : vector<1x1024xi32>
    %87 = vector.shape_cast %86 : vector<1x1024xi1> to vector<1x1024xi1>
    %88 = vector.broadcast %87 : vector<1x1024xi1> to vector<4x1024xi1>
    %89 = arith.select %88, %79, %84 : vector<4x1024xi1>, vector<4x1024xf32>
    %c0_80 = arith.constant 0 : index
    %c0_81 = arith.constant 0 : index
    %c0_82 = arith.constant 0 : index
    %90 = vector.load %arg7[%c0_80, %c0_81, %c0_82] : memref<1x4x1024xf32, #tpu.memory_space<vmem>>, vector<1x4x1024xf32>
    %91 = vector.shape_cast %90 : vector<1x4x1024xf32> to vector<4x1024xf32>
    %92 = vector.shape_cast %89 : vector<4x1024xf32> to vector<1x4x1024xf32>
    tpu.vector_store %arg7[%c0_80, %c0_81, %c0_82], %92 {strides = array<i32>} : memref<1x4x1024xf32, #tpu.memory_space<vmem>>, vector<1x4x1024xf32>,
    return
  }
  func.func @transform_0(%arg0: i32, %arg1: i32) -> (i32, i32, i32, i32) {
    %c0_i32 = arith.constant 0 : i32
    %c0_i32_0 = arith.constant 0 : i32
    %c0_i32_1 = arith.constant 0 : i32
    return %arg0, %arg1, %c0_i32, %c0_i32_0 : i32, i32, i32, i32
  }
  func.func @transform_1(%arg0: i32, %arg1: i32) -> (i32, i32, i32) {
    %c0_i32 = arith.constant 0 : i32
    %c0_i32_0 = arith.constant 0 : i32
    %c0_i32_1 = arith.constant 0 : i32
    %c0_i32_2 = arith.constant 0 : i32
    return %c0_i32, %c0_i32_0, %c0_i32_1 : i32, i32, i32
  }
  func.func @transform_2(%arg0: i32, %arg1: i32) -> (i32, i32, i32) {
    %c0_i32 = arith.constant 0 : i32
    %c0_i32_0 = arith.constant 0 : i32
    %c0_i32_1 = arith.constant 0 : i32
    %c0_i32_2 = arith.constant 0 : i32
    return %c0_i32, %c0_i32_0, %c0_i32_1 : i32, i32, i32
  }
  func.func @transform_3(%arg0: i32, %arg1: i32) -> (i32, i32) {
    %c0_i32 = arith.constant 0 : i32
    %c0_i32_0 = arith.constant 0 : i32
    %c0_i32_1 = arith.constant 0 : i32
    return %c0_i32, %c0_i32_0 : i32, i32
  }
  func.func @transform_4(%arg0: i32, %arg1: i32) -> (i32, i32) {
    %c0_i32 = arith.constant 0 : i32
    %c0_i32_0 = arith.constant 0 : i32
    %c0_i32_1 = arith.constant 0 : i32
    return %c0_i32, %c0_i32_0 : i32, i32
  }
  func.func @transform_5(%arg0: i32, %arg1: i32) -> (i32, i32, i32) {
    %c0_i32 = arith.constant 0 : i32
    %c0_i32_0 = arith.constant 0 : i32
    return %arg0, %c0_i32, %arg1 : i32, i32, i32
  }
}

</mosaic_0001>

<bundles_post_ra>
// kernel: ecre_forward.1
= control target key start
LH: loop header
LB: loop body
LE: loop exit
PB: predicated region body
PF: predicated region fallthrough
CT: control target
= control target key end

     0   :  { %s3170_s18 = smov 0   ;;  %s3172_s19 = smov 0   ;;  %s4085_s0 = inlined_call_operand.vmem [shape: bf16[2,1,4,1156], index: 0, kind: input, shape index: {}]   ;;  %s4086_s1 = inlined_call_operand.vmem [shape: bf16[4,4,36], index: 1, kind: input, shape index: {}]   ;;  %s4087_s2 = inlined_call_operand.vmem [shape: f32[4,4,1], index: 2, kind: input, shape index: {}]   ;;  %s4088_s3 = inlined_call_operand.vmem [shape: s32[1,1024], index: 3, kind: input, shape index: {}]   ;;  %s4089_s4 = inlined_call_operand.vmem [shape: bf16[2,1024], index: 4, kind: input, shape index: {}]   ;;  %s4090_s5 = inlined_call_operand.vmem [shape: f32[2,4,1024], index: 5, kind: output, shape index: {}]  }
   0x1   :  { %s3174_s20 = smov 0  }
   0x2 LB: > { %s27_s21 = sadd.s32 1, %s3124_s19  ;;  %p2977_p0 = scmp.ge.s32.totalorder %s3128_s20, 1  ;;  %s3128_s20 = sphi %s3174_s20, %s15_s20   ;;  %s3124_s19 = sphi %s3172_s19, %s4123_s19   ;;  %s3120_s18 = sphi %s3170_s18, %s4122_s18  }
   0x3   : > { %p29_p1 = scmp.ge.s32.totalorder %s27_s21, 2  ;;  %p207_p2 = scmp.lt.s32.totalorder %s3128_s20, 3 }
   0x5   : > { %s4125_s21 = smov (%p29_p1, %s27_s21), 0  ;;  %p208_p3 = pnand %p2977_p0, %p207_p2 }
   0x6   : > { %v271_v0 = vlaneseq (!%p208_p3)  ;;  %v3130_v1 = vmov (!%p208_p3), 1966171168   ;;  %v3131_v4 = vmov (!%p208_p3), 1983009808   ;;  %v787_v6 = vld [vmem:[%s4089_s4] sm:$0xff] (!%p208_p3)  ;;  %p243_p4 = scmp.lt.s32.totalorder (!%p208_p3), %s3120_s18, 1 }
   0x7   : > { %211 = sbr.rel (%p208_p3) target bundleno = 636 (0x27c), region = 40  ;;  %v269_v2 = vunpack.c.l.s4 (!%p208_p3), %v3130_v1  ;;  %v383_v5 = vunpack.c.l.s4 (!%p208_p3), %v3131_v4  ;;  %v789_v8 = vcombine.high (!%p208_p3), %v787_v6, %v787_v6  ;;  %s3132_s28 = smov (!%p208_p3), 64   ;;  %vm942_vm0 = vcmask (!%p208_p3), 523264  }
   0x8   : > { %v3188_v3 = vshrl.u32 (!%p208_p3), %v271_v0, 7  ;;  %s3133_s29 = smov (!%p208_p3), 4   ;;  %s3134_s30 = smov (!%p208_p3), 68   ;;  %vm703_vm1 = vcmask (!%p208_p3), 1041408   ;;  %vm701_vm2 = vcmask (!%p208_p3), 31744   ;;  %vm1265_vm3 = vcmask (!%p208_p3), 556032  }
   0x9   : > { %v270_v7 = vunpack.c.0.s8 (!%p208_p3), %v269_v2  ;;  %v384_v10 = vunpack.c.0.s8 (!%p208_p3), %v383_v5  ;;  %s3135_s6 = smov (!%p208_p3), 126   ;;  %s3136_s7 = smov (!%p208_p3), 62   ;;  %vm517_vm4 = vcmask (!%p208_p3), 1043456   ;;  %vm519_vm5 = vcmask (!%p208_p3), 1031168  }
   0xa   : > { %v3202_v13 = vsub.s32 (!%p208_p3), 0, %v3188_v3  ;;  %s3137_s10 = smov (!%p208_p3), 124   ;;  %s3138_s11 = smov (!%p208_p3), 60   ;;  %vm1083_vm6 = vcmask (!%p208_p3), 506880   ;;  %vm768_vm7 = vcmask (!%p208_p3), 1014784   ;;  %vm1332_vm8 = vcmask (!%p208_p3), 490496  }
   0xb   : > { %v3196_v9 = vsub.s32 (!%p208_p3), %v270_v7, %v3188_v3  ;;  %v3212_v18 = vsub.s32 (!%p208_p3), %v384_v10, %v3188_v3  ;;  %vm1991_vm9 = vcmask (!%p208_p3), 293888  }
   0xd   : > { %v796_v11 = vrot.slane (!%p208_p3), %v787_v6, %v3196_v9  ;;  %v803_v12 = vrot.slane (!%p208_p3), %v789_v8, %v3196_v9 }
   0xe   : > { %s4127_s18 = smov (!%p243_p4, %s3120_s18), 1 }
   0xf   : > { %s3055_s24 = smul.u32 20, %s4127_s18  ;;  %v804_v14 = vcombine.high %v796_v11, %v796_v11  ;;  %v812_v15 = vrot.slane %v796_v11, %v3196_v9  ;;  %v805_v16 = vcombine.high %v803_v12, %v803_v12  ;;  %v819_v17 = vrot.slane %v803_v12, %v3196_v9  ;;  %s3054_s9 = sshll.u32 %s4127_s18, 5 }
  0x11   : > { %s3209_s27 = scalar_lea.vmem %s4085_s0, %s3055_s24  ;;  %v826_v19 = vrot.slane %v804_v14, %v3196_v9  ;;  %v834_v20 = vcombine.high %v812_v15, %v812_v15  ;;  %v839_v21 = vpack.i.b16 %v812_v15, %v812_v15  ;;  %v590_v22 = vshrl.u32 %v812_v15, 16 }
  0x12   : > { %v833_v23 = vrot.slane %v805_v16, %v3196_v9  ;;  %v835_v24 = vcombine.high %v819_v17, %v819_v17  ;;  %v867_v25 = vpack.i.b16 %v819_v17, %v819_v17  ;;  %v622_v26 = vshrl.u32 %v819_v17, 16 }
  0x13   : > { %v836_v27 = vcombine.high %v826_v19, %v826_v19  ;;  %v844_v28 = vrot.slane %v839_v21, %v3202_v13  ;;  %v846_v29 = vpack.i.b16 %v826_v19, %v826_v19  ;;  %v853_v30 = vpack.i.b16 %v834_v20, %v834_v20 }
  0x14   : > { %v591_v31 = vpack.i.b16 %v590_v22, %v590_v22  ;;  %v598_v32 = vshrl.u32 %v826_v19, 16  ;;  %v606_v33 = vshrl.u32 %v834_v20, 16  ;;  %v837_v34 = vcombine.high %v833_v23, %v833_v23 }
  0x15   : > { %v851_v35 = vrot.slane %v846_v29, %v3202_v13  ;;  %v858_v36 = vrot.slane %v853_v30, %v3202_v13  ;;  %v860_v37 = vpack.i.b16 %v836_v27, %v836_v27  ;;  %v614_v38 = vshrl.u32 %v836_v27, 16  ;;  %v3254_v27 = vld [vmem:[%s3209_s27 + $0x8] sm:$0xff] }
  0x16   : > { %v596_v39 = vrot.slane %v591_v31, %v3202_v13  ;;  %v599_v40 = vpack.i.b16 %v598_v32, %v598_v32  ;;  %v607_v41 = vpack.i.b16 %v606_v33, %v606_v33  ;;  %v872_v42 = vrot.slane %v867_v25, %v3202_v13  ;;  %v3249_v25 = vld [vmem:[%s3209_s27] sm:$0xff] }
  0x17   : > { %v865_v43 = vrot.slane %v860_v37, %v3202_v13  ;;  %v902_v44 = vcombine.low %v844_v28, %v851_v35  ;;  %v615_v45 = vpack.i.b16 %v614_v38, %v614_v38  ;;  %v874_v46 = vpack.i.b16 %v833_v23, %v833_v23  ;;  %v3267_v33 = vld [vmem:[%s3209_s27 + $0x2] sm:$0xff]  ;;  %v3277_v37 = vld [vmem:[%s3209_s27 + $0xa] sm:$0xff] }
  0x18   : > { %v604_v47 = vrot.slane %v599_v40, %v3202_v13  ;;  %v612_v48 = vrot.slane %v607_v41, %v3202_v13  ;;  %v881_v49 = vpack.i.b16 %v835_v24, %v835_v24  ;;  %v888_v50 = vpack.i.b16 %v837_v34, %v837_v34 }
  0x19   : > { %v903_v51 = vcombine.low %v858_v36, %v865_v43  ;;  %v910_v52 = vrot.slane %v902_v44, %v3212_v18  ;;  %v620_v53 = vrot.slane %v615_v45, %v3202_v13  ;;  %v879_v54 = vrot.slane %v874_v46, %v3202_v13  ;;  %v3301_v46 = vld [vmem:[%s4089_s4] sm:$0xff] }
  0x1a   : > { %v661_v55 = vcombine.low %v596_v39, %v604_v47  ;;  %v886_v56 = vrot.slane %v881_v49, %v3202_v13  ;;  %v893_v57 = vrot.slane %v888_v50, %v3202_v13  ;;  %v623_v58 = vpack.i.b16 %v622_v26, %v622_v26  ;;  %v3099_v39 = vld [vmem:[%s3209_s27 + $0x10] ss:$0 sps:$4 sm:$0x33]  }
  0x1b   : > { %v917_v59 = vrot.slane %v903_v51, %v3212_v18  ;;  %v662_v60 = vcombine.low %v612_v48, %v620_v53  ;;  %v919_v61 = vcombine.low %v872_v42, %v879_v54  ;;  %v630_v62 = vshrl.u32 %v833_v23, 16 }
  0x1c   : > { %v669_v63 = vrot.slane %v661_v55, %v3212_v18  ;;  %v920_v0 = vcombine.low %v886_v56, %v893_v57  ;;  %v628_v1 = vrot.slane %v623_v58, %v3202_v13  ;;  %v638_v2 = vshrl.u32 %v835_v24, 16 }
  0x1d   : > { %v3232_v4 = vcombine.low %v910_v52, %v917_v59  ;;  %v676_v5 = vrot.slane %v662_v60, %v3212_v18  ;;  %v927_v6 = vrot.slane %v919_v61, %v3212_v18  ;;  %v631_v7 = vpack.i.b16 %v630_v62, %v630_v62 }
  0x1e   : > { %v934_v8 = vrot.slane %v920_v0, %v3212_v18  ;;  %v639_v10 = vpack.i.b16 %v638_v2, %v638_v2  ;;  %v646_v11 = vshrl.u32 %v837_v34, 16  ;;  %v464_v26 = vcombine.low %v3249_v25, %v3249_v25 }
  0x1f   : > { %936 = vrot.lane.b32.xlu0 %v3232_v4, %s3132_s28  ;;  %v677_v12 = vcombine.low %v669_v63, %v676_v5  ;;  %v636_v14 = vrot.slane %v631_v7, %v3202_v13  ;;  %v479_v29 = vcombine.low %v3254_v27, %v3254_v27  ;;  %v478_v30 = vrot.slane %v3249_v25, %v3212_v18 }
  0x20   : > { %v3240_v15 = vcombine.low %v927_v6, %v934_v8  ;;  %v644_v16 = vrot.slane %v639_v10, %v3202_v13  ;;  %v647_v17 = vpack.i.b16 %v646_v11, %v646_v11  ;;  %v471_v28 = vrot.slane %v464_v26, %v3212_v18 }
  0x21   : > { %695 = vrot.lane.b32.xlu1 %v677_v12, %s3133_s29  ;;  %v678_v19 = vcombine.low %v628_v1, %v636_v14  ;;  %v486_v31 = vrot.slane %v479_v29, %v3212_v18  ;;  %v1030_v32 = vcombine.high %v3249_v25, %v3249_v25  ;;  %v1052_v35 = vrot.slane %v3254_v27, %v3212_v18 }
  0x22   : > { %v652_v20 = vrot.slane %v647_v17, %v3202_v13  ;;  %v1549_v36 = vcombine.low %v3267_v33, %v3267_v33  ;;  %v1563_v38 = vrot.slane %v3267_v33, %v3212_v18  ;;  %v1564_v41 = vcombine.low %v3277_v37, %v3277_v37 }
  0x23   : > { %938 = vrot.lane.b32.xlu0 %v3240_v15, %s3132_s28  ;;  %v686_v21 = vrot.slane %v678_v19, %v3212_v18  ;;  %v1044_v34 = vrot.slane %v1030_v32, %v3212_v18  ;;  %v501_v42 = vrot.slane %v3099_v39, %v3212_v18  ;;  %v1045_v44 = vcombine.high %v3254_v27, %v3254_v27 }
  0x24   : > { %v679_v22 = vcombine.low %v644_v16, %v652_v20  ;;  %v1556_v40 = vrot.slane %v1549_v36, %v3212_v18  ;;  %v1571_v43 = vrot.slane %v1564_v41, %v3212_v18  ;;  %v1359_v47 = vrot.slane %v3301_v46, %v3196_v9  ;;  %v786_v20 = vld [vmem:[%s3209_s27 + $0x10] sm:$0x3] }
  0x25   : > { %v1059_v45 = vrot.slane %v1045_v44, %v3212_v18  ;;  %v416_v53 = vmul.bf16 %v3232_v4, %v3249_v25  ;;  %v417_v1 = vmul.bf16 %v3254_v27, %v3240_v15 }
  0x26   : > { %v693_v23 = vrot.slane %v679_v22, %v3212_v18  ;;  %v1367_v48 = vcombine.high %v1359_v47, %v1359_v47  ;;  %v1375_v49 = vrot.slane %v1359_v47, %v3196_v9 }
  0x27   : > { %1259 = vrot.lane.b32.xlu0 %v677_v12, %s3134_s30  ;;  %2981 = vst.sshfl [vmem:[#allocation2] sm:$0xf pattern:$0x76325410] %v416_v53  ;;  %v420_v62 = vcombine.high %v416_v53, %v416_v53  ;;  %v435_v22 = vcombine.high %v417_v1, %v417_v1 }
  0x28   : > { %v694_v24 = vcombine.low %v686_v21, %v693_v23  ;;  %v1389_v50 = vrot.slane %v1367_v48, %v3196_v9  ;;  %v1397_v51 = vcombine.high %v1375_v49, %v1375_v49  ;;  %v1402_v54 = vpack.i.b16 %v1375_v49, %v1375_v49  ;;  %2983 = vst.sshfl [vmem:[#allocation2 + $0x10] sm:$0xf pattern:$0x76325410] %v417_v1 }
  0x29   : > { %2982 = vst.sshfl [vmem:[#allocation2 + $0x8] sm:$0xf pattern:$0x76325410] %v420_v62  ;;  %v1352_v49 = vcombine.high %v3301_v46, %v3301_v46 }
  0x2a   : > { %697 = vrot.lane.b32.xlu1 %v694_v24, %s3133_s29  ;;  %v1399_v52 = vcombine.high %v1389_v50, %v1389_v50  ;;  %v1409_v55 = vpack.i.b16 %v1389_v50, %v1389_v50  ;;  %v1416_v56 = vpack.i.b16 %v1397_v51, %v1397_v51  ;;  %v1407_v58 = vrot.slane %v1402_v54, %v3202_v13 }
  0x2b   : > { %1778 = vrot.lane.b32.xlu0 %v677_v12, %s3133_s29  ;;  %2984 = vst.sshfl [vmem:[#allocation2 + $0x18] sm:$0xf pattern:$0x76325410] %v435_v22 }
  0x2c   : > { %v1423_v57 = vpack.i.b16 %v1399_v52, %v1399_v52  ;;  %v1414_v59 = vrot.slane %v1409_v55, %v3202_v13  ;;  %v1421_v60 = vrot.slane %v1416_v56, %v3202_v13 }
  0x2e   : > { %1261 = vrot.lane.b32.xlu1 %v694_v24, %s3134_s30  ;;  %v1428_v61 = vrot.slane %v1423_v57, %v3202_v13  ;;  %v1465_v63 = vcombine.low %v1407_v58, %v1414_v59 }
  0x2f   : > { %502 = vrot.lane.b32.xlu0 %v471_v28, %s3135_s6 }
  0x30   : > { %v1466_v0 = vcombine.low %v1421_v60, %v1428_v61  ;;  %v1473_v2 = vrot.slane %v1465_v63, %v3212_v18 }
  0x32   : > { %1780 = vrot.lane.b32.xlu1 %v694_v24, %s3133_s29  ;;  %v1480_v4 = vrot.slane %v1466_v0, %v3212_v18 }
  0x33   : > { %506 = vrot.lane.b32.xlu0 %v486_v31, %s3135_s6  ;;  %v537_v31 = vld [vmem:[%s3209_s27 + $0x10] sm:$0x3] }
  0x34   : > { %v1481_v5 = vcombine.low %v1473_v2, %v1480_v4 }
  0x36   : > { %504 = vrot.lane.b32.xlu1 %v478_v30, %s3135_s6  ;;  %v1501_v6 = vmul.bf16 %v3267_v33, %v1481_v5 }
  0x37   : > { %1069 = vrot.lane.b32.xlu0 %v1044_v34, %s3136_s7 }
  0x38   : > { %2986 = vst.sshfl [vmem:[#allocation2 + $0x60] sm:$0xf pattern:$0x76325410] %v1501_v6  ;;  %v1505_v10 = vcombine.high %v1501_v6, %v1501_v6 }
  0x3a   : > { %1067 = vrot.lane.b32.xlu1 %v478_v30, %s3136_s7  ;;  %2987 = vst.sshfl [vmem:[#allocation2 + $0x68] sm:$0xf pattern:$0x76325410] %v1505_v10 }
  0x3b   : > { %1589 = vrot.lane.b32.xlu0 %v1563_v38, %s3135_s6 }
  0x3e   : > { %1071 = vrot.lane.b32.xlu1 %v1052_v35, %s3136_s7 }
  0x3f   : > { %510 = vrot.lane.b32.xlu0 %v501_v42, %s3135_s6 }
  0x42   : > { %1587 = vrot.lane.b32.xlu1 %v1556_v40, %s3135_s6 }
  0x46   : > { %1591 = vrot.lane.b32.xlu1 %v1571_v43, %s3135_s6 }
  0x4a   : > { %508 = vrot.lane.b32.xlu1 %v1052_v35, %s3135_s6 }
  0x4e   : > { %1073 = vrot.lane.b32.xlu1 %v1059_v45, %s3136_s7 }
  0x91   : > { %v937_v7 = vpop.permute.xlu0 %936 }
  0x92   : > { %v940_v8 = vrot.slane %v937_v7, 6 }
  0x93   : > { %v696_v11 = vpop.permute.xlu1 %695 }
  0x94   : > { %v943_v12 = vsel %vm942_vm0, %v940_v8, %v937_v7  ;;  %v699_v15 = vrot.slane %v696_v11, 6 }
  0x95   : > { %v949_v14 = vmul.bf16 %v943_v12, %v3249_v25  ;;  %v939_v16 = vpop.permute.xlu0 %938 }
  0x96   : > { %v941_v17 = vrot.slane %v939_v16, 6  ;;  %v702_v23 = vsel %vm701_vm2, %v699_v15, %v696_v11 }
  0x97   : > { %v969_v19 = vrot.slane %v949_v14, %v3212_v18  ;;  %v3330_v29 = vmul.bf16 %v702_v23, %v3249_v25  ;;  %v955_v50 = vcombine.low %v949_v14, %v949_v14 }
  0x98   : > { %v944_v21 = vsel %vm703_vm1, %v940_v8, %v941_v17  ;;  %v951_v28 = vmul.bf16 %v941_v17, %v786_v20 }
  0x99   : > { %v945_v24 = vsel %vm942_vm0, %v944_v21, %v939_v16  ;;  %995 = vrot.lane.b32.xlu1 %v969_v19, %s3132_s28  ;;  %v1260_v39 = vpop.permute.xlu0 %1259  ;;  %v722_v41 = vrot.slane %v3330_v29, %v3212_v18  ;;  %v962_v46 = vrot.slane %v955_v50, %v3212_v18 }
  0x9a   : > { %v3327_v26 = vmul.bf16 %v3254_v27, %v945_v24  ;;  %v985_v35 = vcombine.low %v951_v28, %v951_v28  ;;  %v1263_v40 = vrot.slane %v1260_v39, 6 }
  0x9c   : > { %v698_v30 = vpop.permute.xlu1 %697  ;;  %v984_v32 = vrot.slane %v3327_v26, %v3212_v18  ;;  %v1266_v44 = vsel %vm1265_vm3, %v1263_v40, %v1260_v39  ;;  %v992_v48 = vrot.slane %v985_v35, %v3212_v18  ;;  %v970_v4 = vcombine.low %v3327_v26, %v3327_v26 }
  0x9d   : > { %v700_v34 = vrot.slane %v698_v30, 6  ;;  %v3344_v45 = vmul.bf16 %v1266_v44, %v3249_v25  ;;  %v1366_v25 = vrot.slane %v1352_v49, %v3196_v9  ;;  %v1779_v54 = vpop.permute.xlu0 %1778  ;;  %v715_v44 = vcombine.high %v3330_v29, %v3330_v29 }
  0x9e   : > { %999 = vrot.lane.b32.xlu1 %v984_v32, %s3132_s28  ;;  %v1782_v56 = vrot.slane %v1779_v54, 6  ;;  %v977_v21 = vrot.slane %v970_v4, %v3212_v18 }
  0x9f   : > { %v704_v36 = vsel %vm703_vm1, %v699_v15, %v700_v34  ;;  %v711_v38 = vmul.bf16 %v700_v34, %v537_v31  ;;  %v1292_v52 = vrot.slane %v3344_v45, %v3212_v18  ;;  %v1368_v55 = vcombine.high %v1366_v25, %v1366_v25 }
  0xa0   : > { %v705_v43 = vsel %vm701_vm2, %v704_v36, %v698_v30  ;;  %v3346_v47 = vpop.permute.xlu1 %1261  ;;  %v1382_v59 = vrot.slane %v1366_v25, %v3196_v9  ;;  %v1784_v60 = vsel %vm701_vm2, %v1782_v56, %v1779_v54 }
  0xa1   : > { %v751_v42 = vrot.slane %v711_v38, %v3212_v18  ;;  %v3353_v51 = vmul.bf16 %v3254_v27, %v705_v43  ;;  %v1264_v53 = vrot.slane %v3346_v47, 6  ;;  %v1396_v62 = vrot.slane %v1368_v55, %v3196_v9  ;;  %v503_v1 = vpop.permute.xlu0 %502 }
  0xa2   : > { %752 = vrot.lane.b32.xlu1 %v722_v41, %s3137_s10  ;;  %v1790_v63 = vmul.bf16 %v1784_v60, %v3267_v33  ;;  %v1398_v2 = vcombine.high %v1382_v59, %v1382_v59  ;;  %v512_v6 = vrot.slane %v503_v1, 4  ;;  %v1430_v12 = vpack.i.b16 %v1382_v59, %v1382_v59 }
  0xa3   : > { %760 = vrot.lane.b32.xlu0 %v751_v42, %s3137_s10  ;;  %v737_v57 = vrot.slane %v3353_v51, %v3212_v18  ;;  %v1267_v58 = vsel %vm703_vm1, %v1263_v40, %v1264_v53  ;;  %v1400_v33 = vcombine.high %v1396_v62, %v1396_v62  ;;  %v1437_v14 = vpack.i.b16 %v1396_v62, %v1396_v62 }
  0xa4   : > { %v3369_v61 = vpop.permute.xlu1 %1780  ;;  %v1268_v5 = vsel %vm1265_vm3, %v1267_v58, %v3346_v47  ;;  %v1796_v7 = vcombine.high %v1790_v63, %v1790_v63  ;;  %v1803_v9 = vrot.slane %v1790_v63, %v3212_v18  ;;  %v1444_v15 = vpack.i.b16 %v1398_v2, %v1398_v2 }
  0xa5   : > { %v1783_v0 = vrot.slane %v3369_v61, 6  ;;  %v3387_v16 = vmul.bf16 %v1268_v5, %v3254_v27  ;;  %v3391_v20 = vpop.permute.xlu0 %506  ;;  %v1435_v23 = vrot.slane %v1430_v12, %v3202_v13  ;;  %v1442_v24 = vrot.slane %v1437_v14, %v3202_v13 }
  0xa6   : > { %1318 = vrot.lane.b32.xlu1 %v1292_v52, %s3138_s11  ;;  %v1810_v17 = vrot.slane %v1796_v7, %v3212_v18  ;;  %v514_v22 = vrot.slane %v3391_v20, 4  ;;  %v1449_v28 = vrot.slane %v1444_v15, %v3202_v13  ;;  %v1451_v30 = vpack.i.b16 %v1400_v33, %v1400_v33 }
  0xa7   : > { %1001 = vrot.lane.b32.xlu0 %v992_v48, %s3132_s28  ;;  %v1785_v8 = vsel %vm703_vm1, %v1782_v56, %v1783_v0  ;;  %v730_v31 = vcombine.high %v3353_v51, %v3353_v51  ;;  %v1482_v36 = vcombine.low %v1435_v23, %v1442_v24  ;;  %v1307_v38 = vrot.slane %v3387_v16, %v3212_v18  ;;  %v2985_v23 = vld.sshfl [vmem:[%s3209_s27 + $0x10] sm:$0x3 pattern:$0x76325410] }
  0xa8   : > { %v1786_v10 = vsel %vm701_vm2, %v1785_v8, %v3369_v61  ;;  %v505_v11 = vpop.permute.xlu1 %504  ;;  %v1456_v42 = vrot.slane %v1451_v30, %v3202_v13  ;;  %v1578_v56 = vrot.slane %v3277_v37, %v3212_v18  ;;  %v729_v58 = vrot.slane %v715_v44, %v3212_v18  ;;  %v1101_v8 = vld [vmem:[%s3209_s27 + $0x10] sm:$0x3]  ;;  %v3100_v30 = vld [vmem:[%s3209_s27 + $0x12] ss:$0 sps:$4 sm:$0x33]  }
  0xa9   : > { %v513_v19 = vrot.slane %v505_v11, 4  ;;  %v1791_v26 = vmul.bf16 %v1786_v10, %v3277_v37  ;;  %v1070_v41 = vpop.permute.xlu0 %1069  ;;  %v1490_v50 = vrot.slane %v1482_v36, %v3212_v18  ;;  %v744_v25 = vrot.slane %v730_v31, %v3212_v18 }
  0xaa   : > { %756 = vrot.lane.b32.xlu1 %v737_v57, %s3137_s10  ;;  %v1078_v43 = vrot.slane %v1070_v41, 4  ;;  %v1483_v49 = vcombine.low %v1449_v28, %v1456_v42  ;;  %v1278_v57 = vcombine.low %v3344_v45, %v3344_v45  ;;  %v1293_v45 = vcombine.low %v3387_v16, %v3387_v16 }
  0xab   : > { %993 = vrot.lane.b32.xlu0 %v962_v46, %s3132_s28  ;;  %v518_v27 = vsel %vm517_vm4, %v512_v6, %v513_v19  ;;  %v521_v35 = vsel %vm517_vm4, %v513_v19, %v514_v22  ;;  %v1818_v48 = vrot.slane %v1791_v26, %v3212_v18  ;;  %v1274_v12 = vmul.bf16 %v1264_v53, %v1101_v8 }
  0xac   : > { %v1068_v32 = vpop.permute.xlu1 %1067  ;;  %v520_v34 = vsel %vm519_vm5, %v503_v1, %v518_v27  ;;  %v522_v40 = vsel %vm519_vm5, %v505_v11, %v521_v35  ;;  %v1497_v29 = vrot.slane %v1483_v49, %v3212_v18  ;;  %v1811_v1 = vcombine.high %v1791_v26, %v1791_v26 }
  0xad   : > { %v1077_v39 = vrot.slane %v1068_v32, 4  ;;  %531 = vst [vmem:[#allocation2] sm:$0xcc] %v520_v34  ;;  %532 = vst [vmem:[#allocation2 + $0x8] sm:$0xcc] %v522_v40  ;;  %v1590_v46 = vpop.permute.xlu0 %1589  ;;  %v1285_v6 = vrot.slane %v1278_v57, %v3212_v18  ;;  %v1300_v14 = vrot.slane %v1293_v45, %v3212_v18  ;;  %v1308_v47 = vcombine.low %v1274_v12, %v1274_v12 }
  0xae   : > { %1835 = vrot.lane.b32.xlu1 %v1810_v17, %s3137_s10  ;;  %v1498_v60 = vcombine.low %v1490_v50, %v1497_v29  ;;  %v1598_v4 = vrot.slane %v1590_v46, 4  ;;  %v1586_v36 = vrot.slane %v3100_v30, %v3212_v18 }
  0xaf   : > { %1833 = vrot.lane.b32.xlu0 %v1803_v9, %s3137_s10  ;;  %v1082_v52 = vsel %vm517_vm4, %v1077_v39, %v1078_v43  ;;  %v1315_v34 = vrot.slane %v1308_v47, %v3212_v18 }
  0xb0   : > { %v3417_v51 = vpop.permute.xlu1 %1071  ;;  %v1084_v55 = vsel %vm1083_vm6, %v1068_v32, %v1082_v52  ;;  %v1502_v5 = vmul.bf16 %v3277_v37, %v1498_v60  ;;  %v1825_v37 = vrot.slane %v1811_v1, %v3212_v18 }
  0xb1   : > { %v1079_v54 = vrot.slane %v3417_v51, 4  ;;  %1095 = vst [vmem:[#allocation2 + $0x40] sm:$0x33] %v1084_v55  ;;  %v511_v10 = vpop.permute.xlu0 %510 }
  0xb2   : > { %1322 = vrot.lane.b32.xlu1 %v1307_v38, %s3138_s11  ;;  %2988 = vst.sshfl [vmem:[#allocation2 + $0x70] sm:$0xf pattern:$0x76325410] %v1502_v5  ;;  %v516_v16 = vrot.slane %v511_v10, 4  ;;  %v1520_v32 = vcombine.high %v1502_v5, %v1502_v5  ;;  %v3139_v38 = vmov 0  }
  0xb3   : > { %997 = vrot.lane.b32.xlu0 %v977_v21, %s3132_s28  ;;  %v1085_v59 = vsel %vm517_vm4, %v1078_v43, %v1079_v54  ;;  %2052 = vmatprep.mubr.bf16.mxu0 %v3139_v38 }
  0xb4   : > { %v1588_v62 = vpop.permute.xlu1 %1587  ;;  %v1086_v63 = vsel %vm1083_vm6, %v1070_v41, %v1085_v59  ;;  %2989 = vst.sshfl [vmem:[#allocation2 + $0x78] sm:$0xf pattern:$0x76325410] %v1520_v32  ;;  %2093 = vmatprep.mubr.bf16.mxu1 %v3139_v38  ;;  %3090 = vset.pattern.permute.xlu1 %v3139_v38 }
  0xb5   : > { %v1597_v2 = vrot.slane %v1588_v62, 4  ;;  %1096 = vst [vmem:[#allocation2 + $0x48] sm:$0x33] %v1086_v63  ;;  %3091 = vset.pattern.permute.xlu0 %v3139_v38 }
  0xb6   : > { %758 = vrot.lane.b32.xlu1 %v744_v25, %s3137_s10 }
  0xb7   : > { %1837 = vrot.lane.b32.xlu0 %v1818_v48, %s3137_s10  ;;  %v1602_v7 = vsel %vm517_vm4, %v1597_v2, %v1598_v4 }
  0xb8   : > { %v3441_v9 = vpop.permute.xlu1 %1591  ;;  %v1603_v33 = vsel %vm519_vm5, %v1588_v62, %v1602_v7 }
  0xb9   : > { %v1599_v11 = vrot.slane %v3441_v9, 4  ;;  %1614 = vst [vmem:[#allocation2 + $0x60] sm:$0xcc] %v1603_v33 }
  0xba   : > { %1593 = vrot.lane.b32.xlu1 %v1578_v56, %s3135_s6  ;;  %v1885_v56 = vld [vmem:[%s4087_s2] sm:$0xf] }
  0xbb   : > { %754 = vrot.lane.b32.xlu0 %v729_v58, %s3137_s10  ;;  %v1604_v15 = vsel %vm517_vm4, %v1598_v4, %v1599_v11  ;;  %v3033_v58 = vld [vmem:[%s4087_s2 + $0x8] sm:$0xf]  ;;  %v3043_v4 = vld [vmem:[%s4087_s2 + $0xc] sm:$0xf] }
  0xbc   : > { %v509_v17 = vpop.permute.xlu1 %508  ;;  %v1605_v19 = vsel %vm519_vm5, %v1590_v46, %v1604_v15  ;;  %v3023_v46 = vld [vmem:[%s4087_s2 + $0x4] sm:$0xf] }
  0xbd   : > { %v515_v21 = vrot.slane %v509_v17, 4  ;;  %1615 = vst [vmem:[#allocation2 + $0x68] sm:$0xcc] %v1605_v19 }
  0xbe   : > { %1839 = vrot.lane.b32.xlu1 %v1825_v37, %s3137_s10 }
  0xbf   : > { %1316 = vrot.lane.b32.xlu0 %v1285_v6, %s3138_s11  ;;  %v523_v53 = vsel %vm517_vm4, %v514_v22, %v515_v21  ;;  %v525_v24 = vsel %vm517_vm4, %v515_v21, %v516_v16 }
  0xc0   : > { %v524_v26 = vsel %vm519_vm5, %v3391_v20, %v523_v53  ;;  %v3463_v27 = vpop.permute.xlu1 %1073  ;;  %v526_v28 = vsel %vm519_vm5, %v509_v17, %v525_v24  ;;  %v1620_v20 = vld [vmem:[%s3209_s27 + $0x12] sm:$0x3] }
  0xc1   : > { %533 = vst [vmem:[#allocation2 + $0x10] sm:$0xcc] %v524_v26  ;;  %v1080_v31 = vrot.slane %v3463_v27, 4  ;;  %534 = vst [vmem:[#allocation2 + $0x18] sm:$0xcc] %v526_v28  ;;  %v1792_v39 = vmul.bf16 %v1783_v0, %v1620_v20 }
  0xc2   : > { %1888 = vperm.xlu1 %3090, %v1885_v56  }
  0xc3   : > { %1320 = vrot.lane.b32.xlu0 %v1300_v14, %s3138_s11  ;;  %v1087_v22 = vsel %vm517_vm4, %v1079_v54, %v1080_v31  ;;  %v1832_v40 = vrot.slane %v1792_v39, %v3212_v18 }
  0xc4   : > { %v1088_v35 = vsel %vm1083_vm6, %v3417_v51, %v1087_v22 }
  0xc5   : > { %1097 = vst [vmem:[#allocation2 + $0x50] sm:$0x33] %v1088_v35 }
  0xc6   : > { %2366 = vperm.xlu1 %3090, %v3033_v58  }
  0xc7   : > { %1075 = vrot.lane.b32.xlu0 %v2985_v23, %s3136_s7 }
  0xca   : > { %2542 = vperm.xlu1 %3090, %v3043_v4  }
  0xcb   : > { %1324 = vrot.lane.b32.xlu0 %v1315_v34, %s3138_s11  ;;  %s3983_s11 = scalar_lea.vmem %s4090_s5, %s3054_s9 }
  0xcf   : > { %1595 = vrot.lane.b32.xlu0 %v1586_v36, %s3135_s6 }
  0xd3   : > { %1841 = vrot.lane.b32.xlu0 %v1832_v40, %s3137_s10 }
  0xd7   : > { %2190 = vperm.xlu0 %3091, %v3023_v46   ;;  %v1865_v46 = vld [vmem:[#allocation2 + $0x8] sm:$0xff] }
 0x10b   : > { %v996_v41 = vpop.permute.xlu1 %995 }
 0x10c   : > { %v1004_v25 = vrot.slane %v996_v41, 4 }
 0x110   : > { %v1000_v42 = vpop.permute.xlu1 %999 }
 0x111   : > { %v1006_v50 = vrot.slane %v1000_v42, 4 }
 0x114   : > { %v3487_v43 = vpop.permute.xlu1 %752 }
 0x115   : > { %v761_v44 = vpop.permute.xlu0 %760  ;;  %v762_v23 = vrot.slane %v3487_v43, 4 }
 0x116   : > { %v766_v14 = vrot.slane %v761_v44, 4 }
 0x118   : > { %v3489_v49 = vpop.permute.xlu1 %1318 }
 0x119   : > { %v1002_v48 = vpop.permute.xlu0 %1001  ;;  %v1327_v39 = vrot.slane %v3489_v49, 4 }
 0x11a   : > { %v1007_v51 = vrot.slane %v1002_v48, 4 }
 0x11c   : > { %v1014_v61 = vsel %vm517_vm4, %v1006_v50, %v1007_v51  ;;  %v757_v54 = vpop.permute.xlu1 %756 }
 0x11d   : > { %v1015_v0 = vsel %vm942_vm0, %v1000_v42, %v1014_v61  ;;  %v994_v52 = vpop.permute.xlu0 %993  ;;  %v764_v15 = vrot.slane %v757_v54, 4 }
 0x11e   : > { %1023 = vst [vmem:[#allocation2 + $0x38] sm:$0xcc] %v1015_v0  ;;  %v1003_v18 = vrot.slane %v994_v52, 4 }
 0x120   : > { %v1008_v55 = vsel %vm517_vm4, %v1003_v18, %v1004_v25  ;;  %v1836_v59 = vpop.permute.xlu1 %1835  ;;  %v1864_v18 = vld [vmem:[#allocation2] sm:$0xff] }
 0x121   : > { %v1009_v29 = vsel %vm942_vm0, %v994_v52, %v1008_v55  ;;  %v1834_v57 = vpop.permute.xlu0 %1833  ;;  %v1844_v62 = vrot.slane %v1836_v59, 4 }
 0x122   : > { %1020 = vst [vmem:[#allocation2 + $0x20] sm:$0xcc] %v1009_v29  ;;  %v1843_v60 = vrot.slane %v1834_v57, 4 }
 0x124   : > { %v1848_v1 = vsel %vm517_vm4, %v1843_v60, %v1844_v62  ;;  %v3509_v45 = vpop.permute.xlu1 %1322 }
 0x125   : > { %v998_v63 = vpop.permute.xlu0 %997  ;;  %v1849_v5 = vsel %vm768_vm7, %v1834_v57, %v1848_v1  ;;  %v1329_v61 = vrot.slane %v3509_v45, 4 }
 0x126   : > { %v1005_v2 = vrot.slane %v998_v63, 4  ;;  %1860 = vst [vmem:[#allocation2 + $0x80] sm:$0x33] %v1849_v5 }
 0x128   : > { %v1010_v6 = vsel %vm517_vm4, %v1004_v25, %v1005_v2  ;;  %v1012_v7 = vsel %vm517_vm4, %v1005_v2, %v1006_v50  ;;  %v759_v12 = vpop.permute.xlu1 %758 }
 0x129   : > { %v1011_v8 = vsel %vm942_vm0, %v996_v41, %v1010_v6  ;;  %v1013_v33 = vsel %vm942_vm0, %v998_v63, %v1012_v7  ;;  %v1838_v10 = vpop.permute.xlu0 %1837  ;;  %v765_v17 = vrot.slane %v759_v12, 4  ;;  %v1876_v6 = vld [vmem:[#allocation2 + $0x60] sm:$0xff] }
 0x12a   : > { %1021 = vst [vmem:[#allocation2 + $0x28] sm:$0xcc] %v1011_v8  ;;  %1022 = vst [vmem:[#allocation2 + $0x30] sm:$0xcc] %v1013_v33  ;;  %v1845_v37 = vrot.slane %v1838_v10, 4 }
 0x12b   : > { %v772_v47 = vsel %vm517_vm4, %v764_v15, %v765_v17  ;;  %v774_v53 = vsel %vm517_vm4, %v765_v17, %v766_v14 }
 0x12c   : > { %v1850_v16 = vsel %vm517_vm4, %v1844_v62, %v1845_v37  ;;  %v773_v26 = vsel %vm768_vm7, %v757_v54, %v772_v47  ;;  %v775_v28 = vsel %vm768_vm7, %v759_v12, %v774_v53  ;;  %v3522_v30 = vpop.permute.xlu1 %1593  ;;  %v1866_v53 = vld [vmem:[#allocation2 + $0x10] sm:$0xff] }
 0x12d   : > { %v1851_v19 = vsel %vm768_vm7, %v1836_v59, %v1850_v16  ;;  %v755_v21 = vpop.permute.xlu0 %754  ;;  %782 = vst [vmem:[#allocation2 + $0x30] sm:$0x33] %v773_v26  ;;  %783 = vst [vmem:[#allocation2 + $0x38] sm:$0x33] %v775_v28  ;;  %v1600_v22 = vrot.slane %v3522_v30, 4 }
 0x12e   : > { %1861 = vst [vmem:[#allocation2 + $0x88] sm:$0x33] %v1851_v19  ;;  %v763_v24 = vrot.slane %v755_v21, 4  ;;  %v1880_v1 = vld [vmem:[#allocation2 + $0x80] sm:$0x33] }
 0x12f   : > { %v1606_v40 = vsel %vm517_vm4, %v1599_v11, %v1600_v22  ;;  %v3006_v33 = vcombine.low %v1880_v1, %v1880_v1 }
 0x130   : > { %v767_v32 = vsel %vm517_vm4, %v762_v23, %v763_v24  ;;  %v770_v34 = vsel %vm517_vm4, %v763_v24, %v764_v15  ;;  %v1607_v42 = vsel %vm519_vm5, %v3441_v9, %v1606_v40  ;;  %v3538_v44 = vpop.permute.xlu1 %1839  ;;  %v1867_v40 = vld [vmem:[#allocation2 + $0x18] sm:$0xff] }
 0x131   : > { %v769_v20 = vsel %vm768_vm7, %v3487_v43, %v767_v32  ;;  %v771_v35 = vsel %vm768_vm7, %v755_v21, %v770_v34  ;;  %v1317_v36 = vpop.permute.xlu0 %1316  ;;  %1616 = vst [vmem:[#allocation2 + $0x70] sm:$0xcc] %v1607_v42  ;;  %v1846_v48 = vrot.slane %v3538_v44, 4  ;;  %v3588_v47 = vsel %vm703_vm1, %v3006_v33, 0 }
 0x132   : > { %780 = vst [vmem:[#allocation2 + $0x20] sm:$0x33] %v769_v20  ;;  %781 = vst [vmem:[#allocation2 + $0x28] sm:$0x33] %v771_v35  ;;  %v1326_v41 = vrot.slane %v1317_v36, 4 }
 0x133   : > { %v1852_v11 = vsel %vm517_vm4, %v1845_v37, %v1846_v48  ;;  %v3576_v37 = vcombine.high %v1880_v1, %v1880_v1  ;;  %v1884_v20 = vld [vmem:[%s4086_s1] sm:$0x3] }
 0x134   : > { %v1331_v43 = vsel %vm517_vm4, %v1326_v41, %v1327_v39  ;;  %v1853_v9 = vsel %vm768_vm7, %v1838_v10, %v1852_v11  ;;  %v1870_v17 = vld [vmem:[#allocation2 + $0x30] sm:$0xff]  ;;  %v1871_v35 = vld [vmem:[#allocation2 + $0x38] sm:$0xff] }
 0x135   : > { %v1333_v50 = vsel %vm1332_vm8, %v1317_v36, %v1331_v43  ;;  %v1321_v51 = vpop.permute.xlu0 %1320  ;;  %1862 = vst [vmem:[#allocation2 + $0x90] sm:$0x33] %v1853_v9  ;;  %v1881_v16 = vld [vmem:[#allocation2 + $0x88] sm:$0x33]  ;;  %v3596_v26 = vcombine.high %v1866_v53, %v1870_v17  ;;  %v3629_v11 = vcombine.low %v1867_v40, %v1871_v35 }
 0x136   : > { %1344 = vst [vmem:[#allocation2 + $0x40] sm:$0xcc] %v1333_v50  ;;  %v1328_v0 = vrot.slane %v1321_v51, 4  ;;  %v3594_v24 = vcombine.high %v1881_v16, %v1881_v16  ;;  %v3008_v28 = vcombine.low %v1881_v16, %v1881_v16  ;;  %v3619_v50 = vcombine.high %v1867_v40, %v1871_v35 }
 0x138   : > { %v1334_v52 = vsel %vm517_vm4, %v1327_v39, %v1328_v0  ;;  %v1336_v25 = vsel %vm517_vm4, %v1328_v0, %v1329_v61  ;;  %v1878_v39 = vld [vmem:[#allocation2 + $0x70] sm:$0xff]  ;;  %v3615_v42 = vsel %vm703_vm1, %v3008_v28, 0 }
 0x139   : > { %v1335_v54 = vsel %vm1332_vm8, %v3489_v49, %v1334_v52  ;;  %v1337_v55 = vsel %vm1332_vm8, %v1321_v51, %v1336_v25  ;;  %v1076_v29 = vpop.permute.xlu0 %1075  ;;  %v1868_v56 = vld [vmem:[#allocation2 + $0x20] sm:$0xff]  ;;  %v1869_v57 = vld [vmem:[#allocation2 + $0x28] sm:$0xff] }
 0x13a   : > { %1345 = vst [vmem:[#allocation2 + $0x48] sm:$0xcc] %v1335_v54  ;;  %1346 = vst [vmem:[#allocation2 + $0x50] sm:$0xcc] %v1337_v55  ;;  %v1081_v58 = vrot.slane %v1076_v29, 4  ;;  %v3553_v59 = vcombine.high %v1864_v18, %v1868_v56  ;;  %v3555_v60 = vcombine.high %v1865_v46, %v1869_v57  ;;  %v3557_v62 = vcombine.low %v1864_v18, %v1868_v56 }
 0x13b   : > { %v3559_v63 = vcombine.low %v1865_v46, %v1869_v57  ;;  %v3022_v57 = vld [vmem:[%s4086_s1 + $0x2] sm:$0x3] }
 0x13c   : > { %v1089_v49 = vsel %vm517_vm4, %v1080_v31, %v1081_v58  ;;  %2020 = vmatprep.subr.bf16.mxu0 %v3553_v59  ;;  %2061 = vmatprep.subr.bf16.mxu1 %v3555_v60  ;;  %v3032_v58 = vld [vmem:[%s4086_s1 + $0x4] sm:$0x3] }
 0x13d   : > { %v1090_v2 = vsel %vm1083_vm6, %v3463_v27, %v1089_v49  ;;  %v1325_v4 = vpop.permute.xlu0 %1324  ;;  %2021 = vmatpush1.bf16.msra.mxu0 %v3557_v62  ;;  %2062 = vmatpush1.bf16.msra.mxu1 %v3559_v63  ;;  %v1872_v5 = vld [vmem:[#allocation2 + $0x40] sm:$0xff]  ;;  %v1877_v27 = vld [vmem:[#allocation2 + $0x68] sm:$0xff] }
 0x13e   : > { %1098 = vst [vmem:[#allocation2 + $0x58] sm:$0x33] %v1090_v2  ;;  %v1330_v7 = vrot.slane %v1325_v4, 4  ;;  %v3570_v8 = vcombine.high %v1872_v5, %v1876_v6  ;;  %v3572_v31 = vcombine.low %v1872_v5, %v1876_v6  ;;  %v3780_v6 = vld [vmem:[%s4088_s3] sm:$0xff] }
 0x13f   : > { %vm2713_vm10 = vcmp.eq.s32.totalorder %v3780_v6, 0  ;;  %vm2763_vm3 = vcmp.eq.s32.totalorder %v3780_v6, 2 }
 0x140   : > { %v1338_v10 = vsel %vm517_vm4, %v1329_v61, %v1330_v7  ;;  %2022 = vmatprep.subr.bf16.mxu0 %v3570_v8  ;;  %v1882_v61 = vld [vmem:[#allocation2 + $0x90] sm:$0x33] }
 0x141   : > { %v1339_v12 = vsel %vm1332_vm8, %v3509_v45, %v1338_v10  ;;  %v1596_v14 = vpop.permute.xlu0 %1595  ;;  %2023 = vmatpush1.bf16.msra.mxu0 %v3572_v31  ;;  %v1873_v15 = vld [vmem:[#allocation2 + $0x48] sm:$0xff]  ;;  %v3633_v0 = vcombine.high %v1882_v61, %v1882_v61 }
 0x142   : > { %1347 = vst [vmem:[#allocation2 + $0x58] sm:$0xcc] %v1339_v12  ;;  %v1601_v19 = vrot.slane %v1596_v14, 4  ;;  %3014 = vmatprep.subr.msk.bf16.mxu0 %vm703_vm1, %v3576_v37  ;;  %v3583_v21 = vcombine.high %v1873_v15, %v1877_v27  ;;  %v3585_v23 = vcombine.low %v1873_v15, %v1877_v27  ;;  %v2714_v27 = vsel %vm2713_vm10, 1, %v3139_v38 }
 0x143   : > { %v3787_v12 = vsub.s32 1, %v3188_v3  ;;  %v2718_v16 = vrot.slane %v2714_v27, %v3202_v13 }
 0x144   : > { %v1608_v45 = vsel %vm517_vm4, %v1600_v22, %v1601_v19  ;;  %2063 = vmatprep.subr.bf16.mxu1 %v3583_v21  ;;  %v1874_v22 = vld [vmem:[#allocation2 + $0x50] sm:$0xff] }
 0x145   : > { %v1609_v32 = vsel %vm519_vm5, %v3522_v30, %v1608_v45  ;;  %v1842_v34 = vpop.permute.xlu0 %1841  ;;  %2025 = vmatpush1.bf16.msra.mxu0 %v3588_v47  ;;  %2064 = vmatpush1.bf16.msra.mxu1 %v3585_v23  ;;  %v3608_v30 = vcombine.low %v1866_v53, %v1870_v17  ;;  %v3617_v43 = vcombine.high %v1874_v22, %v1878_v39  ;;  %v3791_v17 = vsub.s32 2, %v3188_v3 }
 0x146   : > { %1617 = vst [vmem:[#allocation2 + $0x78] sm:$0xcc] %v1609_v32  ;;  %v1847_v36 = vrot.slane %v1842_v34, 4  ;;  %3016 = vmatprep.subr.msk.bf16.mxu1 %vm703_vm1, %v3594_v24  ;;  %2102 = vmatprep.subr.bf16.mxu0 %v3596_v26  ;;  %v2722_v19 = vrot.slane %v2714_v27, %v3787_v12  ;;  %vm3797_vm11 = vcmp.eq.s32.totalorder %v2718_v16, 1 }
 0x148   : > { %v1854_v41 = vsel %vm517_vm4, %v1846_v48, %v1847_v36  ;;  %3015 = vmatmul.mubr.msk.bf16.vlgmr.msra.gmra.mrb[0].mxu0 %vm1991_vm9, %v1884_v20  ;;  %v3627_v48 = vcombine.low %v1874_v22, %v1878_v39  ;;  %vm3806_vm12 = vcmp.eq.s32.totalorder %v2722_v19, 1  ;;  %vm2813_vm4 = vcmp.lt.s32.totalorder %v3780_v6, 2 }
 0x149   : > { %v1855_v51 = vsel %vm768_vm7, %v3538_v44, %v1854_v41  ;;  %2066 = vmatpush1.bf16.msra.mxu1 %v3615_v42  ;;  %2103 = vmatpush1.bf16.msra.mxu0 %v3608_v30  ;;  %v3010_v44 = vcombine.low %v1882_v61, %v1882_v61  ;;  %v1875_v9 = vld [vmem:[#allocation2 + $0x58] sm:$0xff] }
 0x14a   : > { %1863 = vst [vmem:[#allocation2 + $0x98] sm:$0x33] %v1855_v51  ;;  %2104 = vmatprep.subr.bf16.mxu0 %v3617_v43  ;;  %2143 = vmatprep.subr.bf16.mxu1 %v3619_v50 }
 0x14b   : > { %2134 = vmatprep.mubr.bf16.mxu0 %v3139_v38  ;;  %v3646_v54 = vsel %vm703_vm1, %v3010_v44, 0 }
 0x14c   : > { %3017 = vmatmul.mubr.msk.bf16.vlgmr.msra.gmra.mrb[0].mxu1 %vm1991_vm9, %v1884_v20 }
 0x14d   : > { %2105 = vmatpush1.bf16.msra.mxu0 %v3627_v48  ;;  %2144 = vmatpush1.bf16.msra.mxu1 %v3629_v11  ;;  %v1879_v52 = vld [vmem:[#allocation2 + $0x78] sm:$0xff] }
 0x14e   : > { %3018 = vmatprep.subr.msk.bf16.mxu0 %vm703_vm1, %v3633_v0  ;;  %v3639_v25 = vcombine.high %v1875_v9, %v1879_v52  ;;  %v3641_v18 = vcombine.low %v1875_v9, %v1879_v52  ;;  %2175 = vmatprep.mubr.bf16.mxu1 %v3139_v38 }
 0x150   : > { %2145 = vmatprep.subr.bf16.mxu1 %v3639_v25 }
 0x151   : > { %2107 = vmatpush1.bf16.msra.mxu0 %v3646_v54  ;;  %2146 = vmatpush1.bf16.msra.mxu1 %v3641_v18  ;;  %v1883_v55 = vld [vmem:[#allocation2 + $0x98] sm:$0x33] }
 0x152   : > { %2196 = vmatprep.subr.bf16.mxu0 %v3553_v59  ;;  %v3651_v29 = vcombine.high %v1883_v55, %v1883_v55  ;;  %v3012_v56 = vcombine.low %v1883_v55, %v1883_v55  ;;  %v3855_v55 = vsub.s32 6, %v3188_v3 }
 0x154   : > { %3020 = vmatprep.subr.msk.bf16.mxu1 %vm703_vm1, %v3651_v29  ;;  %3019 = vmatmul.mubr.msk.bf16.vlgmr.msra.gmra.mrb[4].mxu0 %vm1991_vm9, %v1884_v20  ;;  %v3657_v46 = vsel %vm703_vm1, %v3012_v56, 0  ;;  %v3859_v56 = vsub.s32 7, %v3188_v3 }
 0x155   : > { %2148 = vmatpush1.bf16.msra.mxu1 %v3657_v46  ;;  %2197 = vmatpush1.bf16.msra.mxu0 %v3557_v62 }
 0x156   : > { %2198 = vmatprep.subr.bf16.mxu0 %v3570_v8  ;;  %2237 = vmatprep.subr.bf16.mxu1 %v3555_v60 }
 0x157   : > { %2228 = vmatprep.mubr.bf16.mxu0 %v3139_v38 }
 0x158   : > { %3021 = vmatmul.mubr.msk.bf16.vlgmr.msra.gmra.mrb[4].mxu1 %vm1991_vm9, %v1884_v20 }
 0x159   : > { %2199 = vmatpush1.bf16.msra.mxu0 %v3572_v31  ;;  %2238 = vmatpush1.bf16.msra.mxu1 %v3559_v63 }
 0x15a   : > { %3024 = vmatprep.subr.msk.bf16.mxu0 %vm703_vm1, %v3576_v37  ;;  %2239 = vmatprep.subr.bf16.mxu1 %v3583_v21 }
 0x15b   : > { %2269 = vmatprep.mubr.bf16.mxu1 %v3139_v38 }
 0x15d   : > { %2201 = vmatpush1.bf16.msra.mxu0 %v3588_v47  ;;  %2240 = vmatpush1.bf16.msra.mxu1 %v3585_v23 }
 0x15e   : > { %3026 = vmatprep.subr.msk.bf16.mxu1 %vm703_vm1, %v3594_v24  ;;  %2278 = vmatprep.subr.bf16.mxu0 %v3596_v26 }
 0x160   : > { %3025 = vmatmul.mubr.msk.bf16.vlgmr.msra.gmra.mrb[8].mxu0 %vm1991_vm9, %v3022_v57 }
 0x161   : > { %2242 = vmatpush1.bf16.msra.mxu1 %v3615_v42  ;;  %2279 = vmatpush1.bf16.msra.mxu0 %v3608_v30 }
 0x162   : > { %2280 = vmatprep.subr.bf16.mxu0 %v3617_v43  ;;  %2319 = vmatprep.subr.bf16.mxu1 %v3619_v50 }
 0x163   : > { %2310 = vmatprep.mubr.bf16.mxu0 %v3139_v38 }
 0x164   : > { %3027 = vmatmul.mubr.msk.bf16.vlgmr.msra.gmra.mrb[8].mxu1 %vm1991_vm9, %v3022_v57 }
 0x165   : > { %2281 = vmatpush1.bf16.msra.mxu0 %v3627_v48  ;;  %2320 = vmatpush1.bf16.msra.mxu1 %v3629_v11 }
 0x166   : > { %3028 = vmatprep.subr.msk.bf16.mxu0 %vm703_vm1, %v3633_v0  ;;  %2321 = vmatprep.subr.bf16.mxu1 %v3639_v25 }
 0x167   : > { %2351 = vmatprep.mubr.bf16.mxu1 %v3139_v38 }
 0x169   : > { %2283 = vmatpush1.bf16.msra.mxu0 %v3646_v54  ;;  %2322 = vmatpush1.bf16.msra.mxu1 %v3641_v18 }
 0x16a   : > { %3030 = vmatprep.subr.msk.bf16.mxu1 %vm703_vm1, %v3651_v29  ;;  %2372 = vmatprep.subr.bf16.mxu0 %v3553_v59 }
 0x16c   : > { %3029 = vmatmul.mubr.msk.bf16.vlgmr.msra.gmra.mrb[12].mxu0 %vm1991_vm9, %v3022_v57 }
 0x16d   : > { %2324 = vmatpush1.bf16.msra.mxu1 %v3657_v46  ;;  %2373 = vmatpush1.bf16.msra.mxu0 %v3557_v62 }
 0x16e   : > { %2374 = vmatprep.subr.bf16.mxu0 %v3570_v8  ;;  %2413 = vmatprep.subr.bf16.mxu1 %v3555_v60 }
 0x16f   : > { %2404 = vmatprep.mubr.bf16.mxu0 %v3139_v38 }
 0x170   : > { %3031 = vmatmul.mubr.msk.bf16.vlgmr.msra.gmra.mrb[12].mxu1 %vm1991_vm9, %v3022_v57 }
 0x171   : > { %2375 = vmatpush1.bf16.msra.mxu0 %v3572_v31  ;;  %2414 = vmatpush1.bf16.msra.mxu1 %v3559_v63 }
 0x172   : > { %3034 = vmatprep.subr.msk.bf16.mxu0 %vm703_vm1, %v3576_v37  ;;  %2415 = vmatprep.subr.bf16.mxu1 %v3583_v21 }
 0x173   : > { %2445 = vmatprep.mubr.bf16.mxu1 %v3139_v38 }
 0x175   : > { %2377 = vmatpush1.bf16.msra.mxu0 %v3588_v47  ;;  %2416 = vmatpush1.bf16.msra.mxu1 %v3585_v23 }
 0x176   : > { %3036 = vmatprep.subr.msk.bf16.mxu1 %vm703_vm1, %v3594_v24  ;;  %2454 = vmatprep.subr.bf16.mxu0 %v3596_v26 }
 0x178   : > { %3035 = vmatmul.mubr.msk.bf16.vlgmr.msra.gmra.mrb[16].mxu0 %vm1991_vm9, %v3032_v58 }
 0x179   : > { %2418 = vmatpush1.bf16.msra.mxu1 %v3615_v42  ;;  %2455 = vmatpush1.bf16.msra.mxu0 %v3608_v30 }
 0x17a   : > { %2456 = vmatprep.subr.bf16.mxu0 %v3617_v43  ;;  %2495 = vmatprep.subr.bf16.mxu1 %v3619_v50 }
 0x17b   : > { %2486 = vmatprep.mubr.bf16.mxu0 %v3139_v38 }
 0x17c   : > { %3037 = vmatmul.mubr.msk.bf16.vlgmr.msra.gmra.mrb[16].mxu1 %vm1991_vm9, %v3032_v58 }
 0x17d   : > { %2457 = vmatpush1.bf16.msra.mxu0 %v3627_v48  ;;  %2496 = vmatpush1.bf16.msra.mxu1 %v3629_v11 }
 0x17e   : > { %3038 = vmatprep.subr.msk.bf16.mxu0 %vm703_vm1, %v3633_v0  ;;  %2497 = vmatprep.subr.bf16.mxu1 %v3639_v25 }
 0x17f   : > { %2527 = vmatprep.mubr.bf16.mxu1 %v3139_v38 }
 0x181   : > { %2459 = vmatpush1.bf16.msra.mxu0 %v3646_v54  ;;  %2498 = vmatpush1.bf16.msra.mxu1 %v3641_v18 }
 0x182   : > { %3040 = vmatprep.subr.msk.bf16.mxu1 %vm703_vm1, %v3651_v29  ;;  %2548 = vmatprep.subr.bf16.mxu0 %v3553_v59  ;;  %v3042_v59 = vld [vmem:[%s4086_s1 + $0x6] sm:$0x3] }
 0x184   : > { %3039 = vmatmul.mubr.msk.bf16.vlgmr.msra.gmra.mrb[20].mxu0 %vm1991_vm9, %v3032_v58 }
 0x185   : > { %2500 = vmatpush1.bf16.msra.mxu1 %v3657_v46  ;;  %2549 = vmatpush1.bf16.msra.mxu0 %v3557_v62 }
 0x186   : > { %2550 = vmatprep.subr.bf16.mxu0 %v3570_v8  ;;  %2589 = vmatprep.subr.bf16.mxu1 %v3555_v60 }
 0x187   : > { %2580 = vmatprep.mubr.bf16.mxu0 %v3139_v38 }
 0x188   : > { %3041 = vmatmul.mubr.msk.bf16.vlgmr.msra.gmra.mrb[20].mxu1 %vm1991_vm9, %v3032_v58  ;;  %v2742_v58 = vrot.slane %v2714_v27, %v3855_v55 }
 0x189   : > { %2551 = vmatpush1.bf16.msra.mxu0 %v3572_v31  ;;  %2590 = vmatpush1.bf16.msra.mxu1 %v3559_v63 }
 0x18a   : > { %3044 = vmatprep.subr.msk.bf16.mxu0 %vm703_vm1, %v3576_v37  ;;  %2591 = vmatprep.subr.bf16.mxu1 %v3583_v21  ;;  %v3795_v21 = vsub.s32 3, %v3188_v3 }
 0x18b   : > { %2621 = vmatprep.mubr.bf16.mxu1 %v3139_v38 }
 0x18c   : > { %v2730_v20 = vrot.slane %v2714_v27, %v3795_v21 }
 0x18d   : > { %2553 = vmatpush1.bf16.msra.mxu0 %v3588_v47  ;;  %2592 = vmatpush1.bf16.msra.mxu1 %v3585_v23  ;;  %v1889_v23 = vpop.permute.xlu1 %1888  ;;  %v2191_v47 = vpop.permute.xlu0 %2190 }
 0x18e   : > { %3046 = vmatprep.subr.msk.bf16.mxu1 %vm703_vm1, %v3594_v24  ;;  %2630 = vmatprep.subr.bf16.mxu0 %v3596_v26  ;;  %v2726_v24 = vrot.slane %v2714_v27, %v3791_v17  ;;  %vm3834_vm14 = vcmp.eq.s32.totalorder %v2730_v20, 1 }
 0x190   : > { %3045 = vmatmul.mubr.msk.bf16.vlgmr.msra.gmra.mrb[24].mxu0 %vm1991_vm9, %v3042_v59  ;;  %vm3823_vm13 = vcmp.eq.s32.totalorder %v2726_v24, 1 }
 0x191   : > { %2594 = vmatpush1.bf16.msra.mxu1 %v3615_v42  ;;  %2631 = vmatpush1.bf16.msra.mxu0 %v3608_v30 }
 0x192   : > { %2632 = vmatprep.subr.bf16.mxu0 %v3617_v43  ;;  %2671 = vmatprep.subr.bf16.mxu1 %v3619_v50  ;;  %v3828_v43 = vsub.s32 4, %v3188_v3 }
 0x193   : > { %2662 = vmatprep.mubr.bf16.mxu0 %v3139_v38 }
 0x194   : > { %3047 = vmatmul.mubr.msk.bf16.vlgmr.msra.gmra.mrb[24].mxu1 %vm1991_vm9, %v3042_v59 }
 0x195   : > { %2633 = vmatpush1.bf16.msra.mxu0 %v3627_v48  ;;  %2672 = vmatpush1.bf16.msra.mxu1 %v3629_v11  ;;  %v3839_v11 = vsub.s32 5, %v3188_v3 }
 0x196   : > { %3048 = vmatprep.subr.msk.bf16.mxu0 %vm703_vm1, %v3633_v0  ;;  %2673 = vmatprep.subr.bf16.mxu1 %v3639_v25 }
 0x197   : > { %2703 = vmatprep.mubr.bf16.mxu1 %v3139_v38 }
 0x199   : > { %2635 = vmatpush1.bf16.msra.mxu0 %v3646_v54  ;;  %2674 = vmatpush1.bf16.msra.mxu1 %v3641_v18  ;;  %v2734_v54 = vrot.slane %v2714_v27, %v3828_v43 }
 0x19a   : > { %3050 = vmatprep.subr.msk.bf16.mxu1 %vm703_vm1, %v3651_v29  ;;  %v2738_v29 = vrot.slane %v2714_v27, %v3839_v11  ;;  %vm3887_vm1 = vcmp.eq.s32.totalorder %v2742_v58, 1 }
 0x19b   : > { %vm3861_vm15 = vcmp.eq.s32.totalorder %v2734_v54, 1 }
 0x19c   : > { %3049 = vmatmul.mubr.msk.bf16.vlgmr.msra.gmra.mrb[28].mxu0 %vm1991_vm9, %v3042_v59  ;;  %vm3870_vm0 = vcmp.eq.s32.totalorder %v2738_v29, 1 }
 0x19d   : > { %2676 = vmatpush1.bf16.msra.mxu1 %v3657_v46 }
 0x1a0   : > { %3051 = vmatmul.mubr.msk.bf16.vlgmr.msra.gmra.mrb[28].mxu1 %vm1991_vm9, %v3042_v59 }
 0x21b   : > { %v2054_v60 = vpop.f32.mrb[0].mxu0 }
 0x21c   : > { %v2056_v62 = vpop.f32.mrb[1].mxu0  ;;  %v3802_v26 = vadd.f32 %v2054_v60, %v1889_v23 }
 0x21d   : > { %v2058_v63 = vpop.f32.mrb[2].mxu0  ;;  %v3811_v22 = vadd.f32 %v2056_v62, %v1889_v23 }
 0x21e   : > { %v2059_v49 = vpop.f32.mrb[3].mxu0 }
 0x21f   : > { %v2095_v1 = vpop.f32.mrb[0].mxu1  ;;  %v2746_v49 = vrot.slane %v2714_v27, %v3859_v56 }
 0x220   : > { %v2097_v2 = vpop.f32.mrb[1].mxu1  ;;  %v3830_v50 = vadd.f32 %v2095_v1, %v1889_v23 }
 0x221   : > { %v2099_v4 = vpop.f32.mrb[2].mxu1  ;;  %v3841_v0 = vadd.f32 %v2097_v2, %v1889_v23  ;;  %vm3895_vm2 = vcmp.eq.s32.totalorder %v2746_v49, 1  ;;  %v3926_v49 = vsel %vm2813_vm4, 1, %v3139_v38 }
 0x222   : > { %v2100_v5 = vpop.f32.mrb[3].mxu1  ;;  %v2818_v6 = vrot.slane %v3926_v49, %v3202_v13  ;;  %v2842_v48 = vrot.slane %v3926_v49, %v3855_v55 }
 0x224   : > { %vm3944_vm6 = vcmp.eq.s32.totalorder %v2818_v6, 1 }
 0x227   : > { %v2136_v7 = vpop.f32.mrb[4].mxu0 }
 0x228   : > { %v2138_v8 = vpop.f32.mrb[5].mxu0  ;;  %v3866_v59 = vadd.f32 %v2136_v7, %v1889_v23 }
 0x229   : > { %v2140_v31 = vpop.f32.mrb[6].mxu0  ;;  %v3875_v3 = vadd.f32 %v2138_v8, %v1889_v23 }
 0x22a   : > { %v2141_v33 = vpop.f32.mrb[7].mxu0 }
 0x22b   : > { %v2177_v10 = vpop.f32.mrb[4].mxu1 }
 0x22c   : > { %v3783_v37 = vpop.f32.mrb[5].mxu1  ;;  %v3891_v8 = vadd.f32 %v2177_v10, %v1889_v23 }
 0x22d   : > { %v2181_v14 = vpop.f32.mrb[6].mxu1  ;;  %v3900_v16 = vadd.f32 %v3783_v37, %v1889_v23 }
 0x22e   : > { %v2182_v15 = vpop.f32.mrb[7].mxu1 }
 0x233   : > { %v2230_v53 = vpop.f32.mrb[8].mxu0 }
 0x234   : > { %v3804_v28 = vadd.f32 %v2230_v53, %v2191_v47  ;;  %v2232_v32 = vpop.f32.mrb[9].mxu0 }
 0x235   : > { %v3813_v35 = vadd.f32 %v2232_v32, %v2191_v47  ;;  %v2234_v36 = vpop.f32.mrb[10].mxu0 }
 0x236   : > { %v2755_v30 = vsel %vm3797_vm11, %v3802_v26, %v3804_v28  ;;  %v2235_v39 = vpop.f32.mrb[11].mxu0 }
 0x237   : > { %v2756_v40 = vsel %vm3806_vm12, %v3811_v22, %v3813_v35  ;;  %v2271_v41 = vpop.f32.mrb[8].mxu1 }
 0x238   : > { %v3832_v51 = vadd.f32 %v2271_v41, %v2191_v47  ;;  %v2273_v61 = vpop.f32.mrb[9].mxu1 }
 0x239   : > { %v3843_v44 = vadd.f32 %v2273_v61, %v2191_v47  ;;  %v2275_v9 = vpop.f32.mrb[10].mxu1 }
 0x23a   : > { %v2757_v52 = vsel %vm3823_vm13, %v3830_v50, %v3832_v51  ;;  %v2276_v25 = vpop.f32.mrb[11].mxu1  ;;  %v2838_v50 = vrot.slane %v3926_v49, %v3839_v11 }
 0x23b   : > { %v2758_v18 = vsel %vm3834_vm14, %v3841_v0, %v3843_v44 }
 0x23c   : > { %vm2852_vm4 = vcmp.eq.s32.totalorder %v2838_v50, 1 }
 0x23f   : > { %v2312_v46 = vpop.f32.mrb[12].mxu0 }
 0x240   : > { %v3868_v60 = vadd.f32 %v2312_v46, %v2191_v47  ;;  %v2314_v62 = vpop.f32.mrb[13].mxu0 }
 0x241   : > { %v3877_v1 = vadd.f32 %v2314_v62, %v2191_v47  ;;  %v2316_v2 = vpop.f32.mrb[14].mxu0  ;;  %v3923_v62 = vsel %vm2763_vm3, 1, %v3139_v38  ;;  %v2822_v38 = vrot.slane %v3926_v49, %v3787_v12 }
 0x242   : > { %v2759_v4 = vsel %vm3861_vm15, %v3866_v59, %v3868_v60  ;;  %v2317_v5 = vpop.f32.mrb[15].mxu0  ;;  %v3928_v2 = vpop.permute.xlu1 %2366  ;;  %v2788_v42 = vrot.slane %v3923_v62, %v3839_v11 }
 0x243   : > { %v2760_v7 = vsel %vm3870_vm0, %v3875_v3, %v3877_v1  ;;  %v2353_v31 = vpop.f32.mrb[12].mxu1  ;;  %vm2848_vm8 = vcmp.eq.s32.totalorder %v2822_v38, 1 }
 0x244   : > { %v3893_v27 = vadd.f32 %v2353_v31, %v2191_v47  ;;  %v2355_v14 = vpop.f32.mrb[13].mxu1  ;;  %vm4027_vm14 = vcmp.eq.s32.totalorder %v2788_v42, 1 }
 0x245   : > { %v3902_v19 = vadd.f32 %v2355_v14, %v2191_v47  ;;  %v2357_v53 = vpop.f32.mrb[14].mxu1  ;;  %v2768_v14 = vrot.slane %v3923_v62, %v3202_v13  ;;  %v2776_v13 = vrot.slane %v3923_v62, %v3791_v17 }
 0x246   : > { %v2761_v24 = vsel %vm3887_vm1, %v3891_v8, %v3893_v27  ;;  %v2358_v10 = vpop.f32.mrb[15].mxu1  ;;  %v2772_v53 = vrot.slane %v3923_v62, %v3787_v12 }
 0x247   : > { %v3936_v10 = vpop.permute.xlu1 %2542  ;;  %vm3940_vm5 = vcmp.eq.s32.totalorder %v2768_v14, 1  ;;  %vm3976_vm9 = vcmp.eq.s32.totalorder %v2776_v13, 1 }
 0x248   : > { %vm3954_vm7 = vcmp.eq.s32.totalorder %v2772_v53, 1 }
 0x24b   : > { %v2406_v20 = vpop.f32.mrb[16].mxu0 }
 0x24c   : > { %v2408_v36 = vpop.f32.mrb[17].mxu0 }
 0x24d   : > { %v2410_v39 = vpop.f32.mrb[18].mxu0  ;;  %v2409_v14 = vadd.f32 %v2408_v36, %v3928_v2 }
 0x24e   : > { %v2411_v41 = vpop.f32.mrb[19].mxu0 }
 0x24f   : > { %v2447_v37 = vpop.f32.mrb[16].mxu1 }
 0x250   : > { %v2449_v23 = vpop.f32.mrb[17].mxu1  ;;  %v2448_v45 = vadd.f32 %v2447_v37, %v3928_v2  ;;  %v2784_v37 = vrot.slane %v3923_v62, %v3828_v43 }
 0x251   : > { %v2451_v47 = vpop.f32.mrb[18].mxu1 }
 0x252   : > { %v2452_v61 = vpop.f32.mrb[19].mxu1  ;;  %vm4016_vm12 = vcmp.eq.s32.totalorder %v2784_v37, 1 }
 0x253   : > { %v2826_v61 = vrot.slane %v3926_v49, %v3791_v17  ;;  %v2830_v17 = vrot.slane %v3926_v49, %v3795_v21 }
 0x255   : > { %vm2849_vm10 = vcmp.eq.s32.totalorder %v2826_v61, 1  ;;  %vm2850_vm3 = vcmp.eq.s32.totalorder %v2830_v17, 1 }
 0x257   : > { %v3912_v9 = vpop.f32.mrb[20].mxu0 }
 0x258   : > { %v3914_v25 = vpop.f32.mrb[21].mxu0  ;;  %v2489_v0 = vadd.f32 %v3912_v9, %v3928_v2  ;;  %v2846_v9 = vrot.slane %v3926_v49, %v3859_v56 }
 0x259   : > { %v2492_v54 = vpop.f32.mrb[22].mxu0 }
 0x25a   : > { %v2493_v29 = vpop.f32.mrb[23].mxu0  ;;  %v2407_v54 = vadd.f32 %v2406_v20, %v3928_v2 }
 0x25b   : > { %v3918_v46 = vpop.f32.mrb[20].mxu1 }
 0x25c   : > { %v3920_v58 = vpop.f32.mrb[21].mxu1 }
 0x25d   : > { %v2533_v5 = vpop.f32.mrb[22].mxu1 }
 0x25e   : > { %v2534_v31 = vpop.f32.mrb[23].mxu1 }
 0x25f   : > { %v2780_v31 = vrot.slane %v3923_v62, %v3795_v21 }
 0x261   : > { %vm2800_vm11 = vcmp.eq.s32.totalorder %v2780_v31, 1 }
 0x263   : > { %v2582_v39 = vpop.f32.mrb[24].mxu0 }
 0x264   : > { %v2583_v29 = vadd.f32 %v2582_v39, %v3936_v10  ;;  %v2584_v12 = vpop.f32.mrb[25].mxu0 }
 0x265   : > { %v2585_v6 = vadd.f32 %v2584_v12, %v3936_v10  ;;  %v2586_v32 = vpop.f32.mrb[26].mxu0  ;;  %v2491_v12 = vadd.f32 %v3914_v25, %v3928_v2 }
 0x266   : > { %v2805_v20 = vsel %vm3940_vm5, %v2407_v54, %v2583_v29  ;;  %v2587_v53 = vpop.f32.mrb[27].mxu0  ;;  %v2796_v29 = vrot.slane %v3923_v62, %v3859_v56  ;;  %v2530_v56 = vadd.f32 %v3918_v46, %v3928_v2 }
 0x267   : > { %v2855_v39 = vsel %vm3944_vm6, %v2755_v30, %v2805_v20  ;;  %v2806_v36 = vsel %vm3954_vm7, %v2409_v14, %v2585_v6  ;;  %v2623_v38 = vpop.f32.mrb[24].mxu1  ;;  %v2450_v30 = vadd.f32 %v2449_v23, %v3928_v2  ;;  %v2834_v23 = vrot.slane %v3926_v49, %v3828_v43 }
 0x268   : > { %v2856_v21 = vsel %vm2848_vm8, %v2756_v40, %v2806_v36  ;;  %v2624_v26 = vadd.f32 %v2623_v38, %v3936_v10  ;;  %v2625_v28 = vpop.f32.mrb[25].mxu1  ;;  %v2792_v43 = vrot.slane %v3923_v62, %v3855_v55  ;;  %vm2853_vm6 = vcmp.eq.s32.totalorder %v2842_v48, 1 }
 0x269   : > { %v2871_v41 = vcombine.low %v2855_v39, %v2856_v21  ;;  %v2626_v47 = vadd.f32 %v2625_v28, %v3936_v10  ;;  %v2627_v13 = vpop.f32.mrb[26].mxu1  ;;  %vm2851_vm13 = vcmp.eq.s32.totalorder %v2834_v23, 1  ;;  %vm2804_vm15 = vcmp.eq.s32.totalorder %v2796_v29, 1 }
 0x26a   : > { %v2807_v34 = vsel %vm3976_vm9, %v2448_v45, %v2624_v26  ;;  %v2628_v22 = vpop.f32.mrb[27].mxu1  ;;  %vm4047_vm5 = vcmp.eq.s32.totalorder %v2792_v43, 1  ;;  %vm2854_vm7 = vcmp.eq.s32.totalorder %v2846_v9, 1 }
 0x26b   : > { %2879 = vst [vmem:[%s3983_s11] sm:$0xff] %v2871_v41  ;;  %v2857_v35 = vsel %vm2849_vm10, %v2757_v52, %v2807_v34  ;;  %v2808_v40 = vsel %vm2800_vm11, %v2450_v30, %v2626_v47 }
 0x26c   : > { %v2858_v61 = vsel %vm2850_vm3, %v2758_v18, %v2808_v40 }
 0x26d   : > { %v2872_v54 = vcombine.low %v2857_v35, %v2858_v61 }
 0x26f   : > { %2880 = vst [vmem:[%s3983_s11 + $0x8] sm:$0xff] %v2872_v54  ;;  %v2664_v51 = vpop.f32.mrb[28].mxu0 }
 0x270   : > { %v2665_v44 = vadd.f32 %v2664_v51, %v3936_v10  ;;  %v2666_v18 = vpop.f32.mrb[29].mxu0 }
 0x271   : > { %v2667_v5 = vadd.f32 %v2666_v18, %v3936_v10  ;;  %v2668_v55 = vpop.f32.mrb[30].mxu0 }
 0x272   : > { %v2809_v31 = vsel %vm4016_vm12, %v2489_v0, %v2665_v44  ;;  %v2669_v14 = vpop.f32.mrb[31].mxu0 }
 0x273   : > { %v2859_v62 = vsel %vm2851_vm13, %v2759_v4, %v2809_v31  ;;  %v2810_v25 = vsel %vm4027_vm14, %v2491_v12, %v2667_v5  ;;  %v2705_v6 = vpop.f32.mrb[28].mxu1  ;;  %v2532_v4 = vadd.f32 %v3920_v58, %v3928_v2 }
 0x274   : > { %v2860_v57 = vsel %vm2852_vm4, %v2760_v7, %v2810_v25  ;;  %v2706_v59 = vadd.f32 %v2705_v6, %v3936_v10  ;;  %v2707_v60 = vpop.f32.mrb[29].mxu1  ;;  %v4121_v7 = vsel %vm3895_vm2, %v3900_v16, %v3902_v19 }
 0x275   : > { %v2873_v49 = vcombine.low %v2859_v62, %v2860_v57  ;;  %v2708_v20 = vadd.f32 %v2707_v60, %v3936_v10  ;;  %v2709_v53 = vpop.f32.mrb[30].mxu1 }
 0x276   : > { %v2811_v63 = vsel %vm4047_vm5, %v2530_v56, %v2706_v59  ;;  %v2710_v46 = vpop.f32.mrb[31].mxu1 }
 0x277   : > { %2881 = vst [vmem:[%s3983_s11 + $0x10] sm:$0xff] %v2873_v49  ;;  %v2861_v3 = vsel %vm2853_vm6, %v2761_v24, %v2811_v63  ;;  %v2812_v1 = vsel %vm2804_vm15, %v2532_v4, %v2708_v20 }
 0x278   : > { %v2862_v58 = vsel %vm2854_vm7, %v4121_v7, %v2812_v1 }
 0x279   : > { %v2874_v2 = vcombine.low %v2861_v3, %v2862_v58 }
 0x27b   : > { %2882 = vst [vmem:[%s3983_s11 + $0x18] sm:$0xff] %v2874_v2 }
 0x27c PF: > { %s15_s20 = sadd.s32 1, %s3128_s20   ;;  %s4122_s18 = smov %s3124_s19 }
 0x27d   : > { %p12_p5 = scmp.ge.s32.totalorder %s15_s20, 4   ;;  %s4123_s19 = smov %s4125_s21 }
 0x27f   :  { %14 = sbr.rel (!%p12_p5) target bundleno = 2 (0x2), region = 76 }

</bundles_post_ra>
